<compile_context>
chip_gen: v5e
topology: v5e:2x2
jax: 0.10.0
libtpu: 0.0.40
codegen_flags: <defaults>
</compile_context>

<pallas_src>
import functools

import jax
import jax.numpy as jnp
import numpy as np
from jax import lax
from jax.experimental import pallas as pl
from jax.experimental.pallas import tpu as pltpu


# ------------------------------ Pallas kernel ------------------------------ #

_TAPS = tuple((dy, dx) for dy in (-1, 0, 1) for dx in (-1, 0, 1))


def _refine_kernel(f_ref, pmup_ref, tapmask_ref, wfs_ref, w1a_ref, w2a_ref,
                   w1b_ref, w2b_ref, b_ref, o_ref, *, W, n):
    # Per-tap zero masks (row-halo + column-edge combined), read once and
    # shared by all five convs.
    tapmask = tapmask_ref[...]                                   # (9, n) f32

    def conv3x3(x, w_ref, bias_idx, relu_input):
        # x: (C, n) f32 flat-NCHW activation -> (Cout, n) f32.
        if relu_input:
            x = jnp.maximum(x, 0.0)
        xb_center = x.astype(jnp.bfloat16)                       # center tap
        acc = None
        for t, (dy, dx) in enumerate(_TAPS):
            off = dy * W + dx
            if off == 0:
                tap = xb_center                                  # mask is all-ones
            else:
                # Circular lane shift on the XLU; source positions that fall
                # outside the image wrap around and are zeroed by the mask.
                rolled = pltpu.roll(x, shift=(-off) % n, axis=1)
                tap = (rolled * tapmask[t:t + 1, :]).astype(jnp.bfloat16)
            part = jnp.dot(w_ref[t], tap,                        # bf16 x bf16
                           preferred_element_type=jnp.float32)   # f32 accumulate
            acc = part if acc is None else acc + part
        return acc + b_ref[:, bias_idx:bias_idx + 1]             # bias once, f32

    f = f_ref[...]                                               # (Cin, n) f32
    # s = ResFS(convFS(f))
    s = conv3x3(f, wfs_ref, 0, relu_input=False)
    r = conv3x3(s, w1a_ref, 1, relu_input=True)
    r = conv3x3(r, w2a_ref, 2, relu_input=True)
    s = s + r
    # m = s + upsample(pm)
    m = s + pmup_ref[...]
    # m = ResMM(m)
    r = conv3x3(m, w1b_ref, 3, relu_input=True)
    r = conv3x3(r, w2b_ref, 4, relu_input=True)
    o_ref[...] = m + r                                           # lane-dense store


# -------------------------- upsample (plain JAX) --------------------------- #

def bilinear_upsample_x2(x):
    """F.interpolate(scale_factor=2, mode='bilinear', align_corners=False) on
    NCHW, written as fixed-weight (0.25 / 0.75) shifts + interleave — no
    gathers, matches PyTorch boundary handling exactly."""
    B, C, H, W = x.shape
    up = jnp.concatenate([x[:, :, :1], x[:, :, :-1]], axis=2)    # row h-1 (clamped)
    dn = jnp.concatenate([x[:, :, 1:], x[:, :, -1:]], axis=2)    # row h+1 (clamped)
    even = 0.25 * up + 0.75 * x
    odd = 0.75 * x + 0.25 * dn
    x = jnp.stack([even, odd], axis=3).reshape(B, C, 2 * H, W)
    lf = jnp.concatenate([x[:, :, :, :1], x[:, :, :, :-1]], axis=3)
    rt = jnp.concatenate([x[:, :, :, 1:], x[:, :, :, -1:]], axis=3)
    even = 0.25 * lf + 0.75 * x
    odd = 0.75 * x + 0.25 * rt
    return jnp.stack([even, odd], axis=4).reshape(B, C, 2 * H, 2 * W)


# ------------------------------ forward (fused) ----------------------------- #

def refine_forward(f_nchw, pm_nchw, params):
    B, Cin, H, W = f_nchw.shape
    Cout = params["convFS_w"].shape[0]
    n = H * W

    def wmat(w_oihw):
        co, ci = w_oihw.shape[0], w_oihw.shape[1]
        # OIHW -> (ky, kx, Cout, Cin) -> (9, Cout, Cin), tap-major, bf16 MXU operand.
        return jnp.transpose(w_oihw, (2, 3, 0, 1)).reshape(9, co, ci).astype(jnp.bfloat16)

    wfs = wmat(params["convFS_w"])
    w1a = wmat(params["ResFS_c1_w"])
    w2a = wmat(params["ResFS_c2_w"])
    w1b = wmat(params["ResMM_c1_w"])
    w2b = wmat(params["ResMM_c2_w"])
    bcols = jnp.stack([params["convFS_b"], params["ResFS_c1_b"],
                       params["ResFS_c2_b"], params["ResMM_c1_b"],
                       params["ResMM_c2_b"]], axis=1)            # (Cout, 5) f32

    # Per-tap zero masks: tap t=(dy+1)*3+(dx+1) is valid at flat position p iff
    # (h+dy, w+dx) lies inside the image (h = p // W, w = p % W).
    pos = jnp.arange(n, dtype=jnp.int32)
    hh, ww = pos // W, pos % W
    masks = []
    for dy in (-1, 0, 1):
        for dx in (-1, 0, 1):
            ok = ((hh + dy >= 0) & (hh + dy < H) & (ww + dx >= 0) & (ww + dx < W))
            masks.append(ok)
    tapmask = jnp.stack(masks, axis=0).astype(jnp.float32)       # (9, n)

    f_flat = f_nchw.reshape(B, Cin, n)
    pm_up = bilinear_upsample_x2(pm_nchw).reshape(B, Cout, n)

    flops = int(2 * B * n * 9 * (Cout * Cin + 4 * Cout * Cout))
    bytes_accessed = int(
        f_flat.size * 4 + pm_up.size * 4 + B * Cout * n * 4
        + (wfs.size + w1a.size + w2a.size + w1b.size + w2b.size) * 2
        + bcols.size * 4 + tapmask.size * 4)

    kernel = functools.partial(_refine_kernel, W=W, n=n)
    out = pl.pallas_call(
        kernel,
        out_shape=jax.ShapeDtypeStruct((B, Cout, n), jnp.float32),
        grid=(B,),
        in_specs=[
            pl.BlockSpec((None, Cin, n), lambda i: (i, 0, 0)),      # f
            pl.BlockSpec((None, Cout, n), lambda i: (i, 0, 0)),     # upsampled pm
            pl.BlockSpec((9, n), lambda i: (0, 0)),                 # per-tap masks
            pl.BlockSpec((9, Cout, Cin), lambda i: (0, 0, 0)),      # convFS w (bf16)
            pl.BlockSpec((9, Cout, Cout), lambda i: (0, 0, 0)),     # ResFS c1 w
            pl.BlockSpec((9, Cout, Cout), lambda i: (0, 0, 0)),     # ResFS c2 w
            pl.BlockSpec((9, Cout, Cout), lambda i: (0, 0, 0)),     # ResMM c1 w
            pl.BlockSpec((9, Cout, Cout), lambda i: (0, 0, 0)),     # ResMM c2 w
            pl.BlockSpec((Cout, 5), lambda i: (0, 0)),              # biases (f32)
        ],
        out_specs=pl.BlockSpec((None, Cout, n), lambda i: (i, 0, 0)),
        compiler_params=pltpu.CompilerParams(
            dimension_semantics=("parallel",)),   # v7x: batch splits across 2 TCs
        cost_estimate=pl.CostEstimate(flops=flops, transcendentals=0,
                                      bytes_accessed=bytes_accessed),
    )(f_flat, pm_up, tapmask, wfs, w1a, w2a, w1b, w2b, bcols)

    return out.reshape(B, Cout, H, W)


# --------------------------------- reference -------------------------------- #

def _conv3x3_ref(x, w_oihw, b):
    y = lax.conv_general_dilated(
        x, w_oihw, window_strides=(1, 1), padding="SAME",
        dimension_numbers=("NCHW", "OIHW", "NCHW"),
        precision=lax.Precision.HIGHEST)
    return y + b[None, :, None, None]


def _bilinear_upsample_x2_ref(x):
    # Gather-based PyTorch align_corners=False math (reference only).
    B, C, H, W = x.shape

    def idx_w(num):
        out = jnp.arange(2 * num, dtype=jnp.float32)
        src = jnp.maximum((out + 0.5) / 2.0 - 0.5, 0.0)
        i0 = jnp.floor(src).astype(jnp.int32)
        i1 = jnp.minimum(i0 + 1, num - 1)
        w1 = src - i0.astype(jnp.float32)
        return i0, i1, w1

    h0, h1, wh = idx_w(H)
    c0, c1, wc = idx_w(W)
    rows = (x[:, :, h0, :] * (1.0 - wh)[None, None, :, None]
            + x[:, :, h1, :] * wh[None, None, :, None])
    return (rows[:, :, :, c0] * (1.0 - wc)[None, None, None, :]
            + rows[:, :, :, c1] * wc[None, None, None, :])


def _resblock_ref(x, w1, b1, w2, b2):
    r = _conv3x3_ref(jnp.maximum(x, 0.0), w1, b1)
    r = _conv3x3_ref(jnp.maximum(r, 0.0), w2, b2)
    return x + r


def _refine_ref(f, pm, p):
    s = _conv3x3_ref(f, p["convFS_w"], p["convFS_b"])
    s = _resblock_ref(s, p["ResFS_c1_w"], p["ResFS_c1_b"],
                      p["ResFS_c2_w"], p["ResFS_c2_b"])
    m = s + _bilinear_upsample_x2_ref(pm)
    m = _resblock_ref(m, p["ResMM_c1_w"], p["ResMM_c1_b"],
                      p["ResMM_c2_w"], p["ResMM_c2_b"])
    return m


# ----------------------------------- main ----------------------------------- #

if __name__ == "__main__":
    B, inplanes, planes, H, W = 2, 4, 8, 16, 16
    key = jax.random.PRNGKey(0)
    ks = jax.random.split(key, 12)

    def w_init(k, cout, cin):
        return 0.1 * jax.random.normal(k, (cout, cin, 3, 3), jnp.float32)

    def b_init(k, cout):
        return 0.05 * jax.random.normal(k, (cout,), jnp.float32)

    params = {
        "convFS_w": w_init(ks[0], planes, inplanes), "convFS_b": b_init(ks[1], planes),
        "ResFS_c1_w": w_init(ks[2], planes, planes), "ResFS_c1_b": b_init(ks[3], planes),
        "ResFS_c2_w": w_init(ks[4], planes, planes), "ResFS_c2_b": b_init(ks[5], planes),
        "ResMM_c1_w": w_init(ks[6], planes, planes), "ResMM_c1_b": b_init(ks[7], planes),
        "ResMM_c2_w": w_init(ks[8], planes, planes), "ResMM_c2_b": b_init(ks[9], planes),
    }

    # PyTorch-native NCHW inputs.
    f = jax.random.normal(ks[10], (B, inplanes, H, W), jnp.float32)
    pm = jax.random.normal(ks[11], (B, planes, H // 2, W // 2), jnp.float32)

    out = jax.block_until_ready(jax.jit(refine_forward)(f, pm, params))
    ref = jax.block_until_ready(_refine_ref(f, pm, params))

    # bf16 MXU operands (f32 accumulation) vs a full-f32 HIGHEST-precision
    # reference: tolerances loosened accordingly (5 chained convs).
    np.testing.assert_allclose(np.asarray(out), np.asarray(ref),
                               rtol=5e-2, atol=5e-2)

    assert out.shape == (B, planes, H, W)   # PyTorch NCHW output shape
    print("KERNEL_OK")
</pallas_src>

<mosaic_0001>
module attributes {stable_mosaic.version = 11 : i64} {
  func.func @_refine_kernel(%arg0: i32, %arg1: memref<1x4x256xf32, #tpu.memory_space<vmem>>, %arg2: memref<1x8x256xf32, #tpu.memory_space<vmem>>, %arg3: memref<9x256xf32, #tpu.memory_space<vmem>>, %arg4: memref<9x8x4xbf16, #tpu.memory_space<vmem>>, %arg5: memref<9x8x8xbf16, #tpu.memory_space<vmem>>, %arg6: memref<9x8x8xbf16, #tpu.memory_space<vmem>>, %arg7: memref<9x8x8xbf16, #tpu.memory_space<vmem>>, %arg8: memref<9x8x8xbf16, #tpu.memory_space<vmem>>, %arg9: memref<8x5xf32, #tpu.memory_space<vmem>>, %arg10: memref<1x8x256xf32, #tpu.memory_space<vmem>>) attributes {dimension_semantics = [#tpu.dimension_semantics<parallel>], iteration_bounds = array<i64: 2>, scalar_prefetch = 0 : i64, scratch_operands = 0 : i64, tpu.core_type = #tpu.core_type<tc>, window_params = [{transform_indices = @transform_0, window_bounds = array<i64: 1, 4, 256>}, {transform_indices = @transform_1, window_bounds = array<i64: 1, 8, 256>}, {pipeline_mode = #tpu.pipeline_mode<synchronous>, transform_indices = @transform_2, window_bounds = array<i64: 9, 256>}, {pipeline_mode = #tpu.pipeline_mode<synchronous>, transform_indices = @transform_3, window_bounds = array<i64: 9, 8, 4>}, {pipeline_mode = #tpu.pipeline_mode<synchronous>, transform_indices = @transform_4, window_bounds = array<i64: 9, 8, 8>}, {pipeline_mode = #tpu.pipeline_mode<synchronous>, transform_indices = @transform_5, window_bounds = array<i64: 9, 8, 8>}, {pipeline_mode = #tpu.pipeline_mode<synchronous>, transform_indices = @transform_6, window_bounds = array<i64: 9, 8, 8>}, {pipeline_mode = #tpu.pipeline_mode<synchronous>, transform_indices = @transform_7, window_bounds = array<i64: 9, 8, 8>}, {pipeline_mode = #tpu.pipeline_mode<synchronous>, transform_indices = @transform_8, window_bounds = array<i64: 8, 5>}, {transform_indices = @transform_9, window_bounds = array<i64: 1, 8, 256>}]} {
    %c0 = arith.constant 0 : index
    %c0_0 = arith.constant 0 : index
    %0 = vector.load %arg3[%c0, %c0_0] : memref<9x256xf32, #tpu.memory_space<vmem>>, vector<9x256xf32>
    %c0_1 = arith.constant 0 : index
    %c0_2 = arith.constant 0 : index
    %c0_3 = arith.constant 0 : index
    %1 = vector.load %arg1[%c0_1, %c0_2, %c0_3] : memref<1x4x256xf32, #tpu.memory_space<vmem>>, vector<1x4x256xf32>
    %2 = vector.shape_cast %1 : vector<1x4x256xf32> to vector<4x256xf32>
    %3 = arith.truncf %2 : vector<4x256xf32> to vector<4x256xbf16>
    %c17_i32 = arith.constant 17 : i32
    %4 = tpu.dynamic_rotate %2 by %c17_i32 dim 1 : vector<4x256xf32>, i32 -> vector<4x256xf32>
    %5 = vector.extract_strided_slice %0 {offsets = [0, 0], sizes = [1, 256], strides = [1, 1]} : vector<9x256xf32> to vector<1x256xf32>
    %6 = vector.broadcast %5 : vector<1x256xf32> to vector<4x256xf32>
    %7 = arith.mulf %4, %6 : vector<4x256xf32>
    %8 = arith.truncf %7 : vector<4x256xf32> to vector<4x256xbf16>
    %c0_4 = arith.constant 0 : index
    %c0_5 = arith.constant 0 : index
    %c0_6 = arith.constant 0 : index
    %9 = vector.load %arg4[%c0_4, %c0_5, %c0_6] : memref<9x8x4xbf16, #tpu.memory_space<vmem>>, vector<1x8x4xbf16>
    %10 = vector.shape_cast %9 : vector<1x8x4xbf16> to vector<8x4xbf16>
    %cst = arith.constant dense<0.000000e+00> : vector<8x256xf32>
    %11 = tpu.matmul %10, %8, %cst {dimension_numbers = #tpu.dot_dimension_numbers<[1], [0], [0], [1], [0, 0, 1, 1], [], []>} : vector<8x4xbf16>, vector<4x256xbf16>, vector<8x256xf32> -> vector<8x256xf32>
    %c16_i32 = arith.constant 16 : i32
    %12 = tpu.dynamic_rotate %2 by %c16_i32 dim 1 : vector<4x256xf32>, i32 -> vector<4x256xf32>
    %13 = vector.extract_strided_slice %0 {offsets = [1, 0], sizes = [1, 256], strides = [1, 1]} : vector<9x256xf32> to vector<1x256xf32>
    %14 = vector.broadcast %13 : vector<1x256xf32> to vector<4x256xf32>
    %15 = arith.mulf %12, %14 : vector<4x256xf32>
    %16 = arith.truncf %15 : vector<4x256xf32> to vector<4x256xbf16>
    %c1 = arith.constant 1 : index
    %c0_7 = arith.constant 0 : index
    %c0_8 = arith.constant 0 : index
    %17 = vector.load %arg4[%c1, %c0_7, %c0_8] : memref<9x8x4xbf16, #tpu.memory_space<vmem>>, vector<1x8x4xbf16>
    %18 = vector.shape_cast %17 : vector<1x8x4xbf16> to vector<8x4xbf16>
    %cst_9 = arith.constant dense<0.000000e+00> : vector<8x256xf32>
    %19 = tpu.matmul %18, %16, %cst_9 {dimension_numbers = #tpu.dot_dimension_numbers<[1], [0], [0], [1], [0, 0, 1, 1], [], []>} : vector<8x4xbf16>, vector<4x256xbf16>, vector<8x256xf32> -> vector<8x256xf32>
    %20 = arith.addf %11, %19 : vector<8x256xf32>
    %c15_i32 = arith.constant 15 : i32
    %21 = tpu.dynamic_rotate %2 by %c15_i32 dim 1 : vector<4x256xf32>, i32 -> vector<4x256xf32>
    %22 = vector.extract_strided_slice %0 {offsets = [2, 0], sizes = [1, 256], strides = [1, 1]} : vector<9x256xf32> to vector<1x256xf32>
    %23 = vector.broadcast %22 : vector<1x256xf32> to vector<4x256xf32>
    %24 = arith.mulf %21, %23 : vector<4x256xf32>
    %25 = arith.truncf %24 : vector<4x256xf32> to vector<4x256xbf16>
    %c2 = arith.constant 2 : index
    %c0_10 = arith.constant 0 : index
    %c0_11 = arith.constant 0 : index
    %26 = vector.load %arg4[%c2, %c0_10, %c0_11] : memref<9x8x4xbf16, #tpu.memory_space<vmem>>, vector<1x8x4xbf16>
    %27 = vector.shape_cast %26 : vector<1x8x4xbf16> to vector<8x4xbf16>
    %cst_12 = arith.constant dense<0.000000e+00> : vector<8x256xf32>
    %28 = tpu.matmul %27, %25, %cst_12 {dimension_numbers = #tpu.dot_dimension_numbers<[1], [0], [0], [1], [0, 0, 1, 1], [], []>} : vector<8x4xbf16>, vector<4x256xbf16>, vector<8x256xf32> -> vector<8x256xf32>
    %29 = arith.addf %20, %28 : vector<8x256xf32>
    %c1_i32 = arith.constant 1 : i32
    %30 = tpu.dynamic_rotate %2 by %c1_i32 dim 1 : vector<4x256xf32>, i32 -> vector<4x256xf32>
    %31 = vector.extract_strided_slice %0 {offsets = [3, 0], sizes = [1, 256], strides = [1, 1]} : vector<9x256xf32> to vector<1x256xf32>
    %32 = vector.broadcast %31 : vector<1x256xf32> to vector<4x256xf32>
    %33 = arith.mulf %30, %32 : vector<4x256xf32>
    %34 = arith.truncf %33 : vector<4x256xf32> to vector<4x256xbf16>
    %c3 = arith.constant 3 : index
    %c0_13 = arith.constant 0 : index
    %c0_14 = arith.constant 0 : index
    %35 = vector.load %arg4[%c3, %c0_13, %c0_14] : memref<9x8x4xbf16, #tpu.memory_space<vmem>>, vector<1x8x4xbf16>
    %36 = vector.shape_cast %35 : vector<1x8x4xbf16> to vector<8x4xbf16>
    %cst_15 = arith.constant dense<0.000000e+00> : vector<8x256xf32>
    %37 = tpu.matmul %36, %34, %cst_15 {dimension_numbers = #tpu.dot_dimension_numbers<[1], [0], [0], [1], [0, 0, 1, 1], [], []>} : vector<8x4xbf16>, vector<4x256xbf16>, vector<8x256xf32> -> vector<8x256xf32>
    %38 = arith.addf %29, %37 : vector<8x256xf32>
    %c4 = arith.constant 4 : index
    %c0_16 = arith.constant 0 : index
    %c0_17 = arith.constant 0 : index
    %39 = vector.load %arg4[%c4, %c0_16, %c0_17] : memref<9x8x4xbf16, #tpu.memory_space<vmem>>, vector<1x8x4xbf16>
    %40 = vector.shape_cast %39 : vector<1x8x4xbf16> to vector<8x4xbf16>
    %cst_18 = arith.constant dense<0.000000e+00> : vector<8x256xf32>
    %41 = tpu.matmul %40, %3, %cst_18 {dimension_numbers = #tpu.dot_dimension_numbers<[1], [0], [0], [1], [0, 0, 1, 1], [], []>} : vector<8x4xbf16>, vector<4x256xbf16>, vector<8x256xf32> -> vector<8x256xf32>
    %42 = arith.addf %38, %41 : vector<8x256xf32>
    %c255_i32 = arith.constant 255 : i32
    %43 = tpu.dynamic_rotate %2 by %c255_i32 dim 1 : vector<4x256xf32>, i32 -> vector<4x256xf32>
    %44 = vector.extract_strided_slice %0 {offsets = [5, 0], sizes = [1, 256], strides = [1, 1]} : vector<9x256xf32> to vector<1x256xf32>
    %45 = vector.broadcast %44 : vector<1x256xf32> to vector<4x256xf32>
    %46 = arith.mulf %43, %45 : vector<4x256xf32>
    %47 = arith.truncf %46 : vector<4x256xf32> to vector<4x256xbf16>
    %c5 = arith.constant 5 : index
    %c0_19 = arith.constant 0 : index
    %c0_20 = arith.constant 0 : index
    %48 = vector.load %arg4[%c5, %c0_19, %c0_20] : memref<9x8x4xbf16, #tpu.memory_space<vmem>>, vector<1x8x4xbf16>
    %49 = vector.shape_cast %48 : vector<1x8x4xbf16> to vector<8x4xbf16>
    %cst_21 = arith.constant dense<0.000000e+00> : vector<8x256xf32>
    %50 = tpu.matmul %49, %47, %cst_21 {dimension_numbers = #tpu.dot_dimension_numbers<[1], [0], [0], [1], [0, 0, 1, 1], [], []>} : vector<8x4xbf16>, vector<4x256xbf16>, vector<8x256xf32> -> vector<8x256xf32>
    %51 = arith.addf %42, %50 : vector<8x256xf32>
    %c241_i32 = arith.constant 241 : i32
    %52 = tpu.dynamic_rotate %2 by %c241_i32 dim 1 : vector<4x256xf32>, i32 -> vector<4x256xf32>
    %53 = vector.extract_strided_slice %0 {offsets = [6, 0], sizes = [1, 256], strides = [1, 1]} : vector<9x256xf32> to vector<1x256xf32>
    %54 = vector.broadcast %53 : vector<1x256xf32> to vector<4x256xf32>
    %55 = arith.mulf %52, %54 : vector<4x256xf32>
    %56 = arith.truncf %55 : vector<4x256xf32> to vector<4x256xbf16>
    %c6 = arith.constant 6 : index
    %c0_22 = arith.constant 0 : index
    %c0_23 = arith.constant 0 : index
    %57 = vector.load %arg4[%c6, %c0_22, %c0_23] : memref<9x8x4xbf16, #tpu.memory_space<vmem>>, vector<1x8x4xbf16>
    %58 = vector.shape_cast %57 : vector<1x8x4xbf16> to vector<8x4xbf16>
    %cst_24 = arith.constant dense<0.000000e+00> : vector<8x256xf32>
    %59 = tpu.matmul %58, %56, %cst_24 {dimension_numbers = #tpu.dot_dimension_numbers<[1], [0], [0], [1], [0, 0, 1, 1], [], []>} : vector<8x4xbf16>, vector<4x256xbf16>, vector<8x256xf32> -> vector<8x256xf32>
    %60 = arith.addf %51, %59 : vector<8x256xf32>
    %c240_i32 = arith.constant 240 : i32
    %61 = tpu.dynamic_rotate %2 by %c240_i32 dim 1 : vector<4x256xf32>, i32 -> vector<4x256xf32>
    %62 = vector.extract_strided_slice %0 {offsets = [7, 0], sizes = [1, 256], strides = [1, 1]} : vector<9x256xf32> to vector<1x256xf32>
    %63 = vector.broadcast %62 : vector<1x256xf32> to vector<4x256xf32>
    %64 = arith.mulf %61, %63 : vector<4x256xf32>
    %65 = arith.truncf %64 : vector<4x256xf32> to vector<4x256xbf16>
    %c7 = arith.constant 7 : index
    %c0_25 = arith.constant 0 : index
    %c0_26 = arith.constant 0 : index
    %66 = vector.load %arg4[%c7, %c0_25, %c0_26] : memref<9x8x4xbf16, #tpu.memory_space<vmem>>, vector<1x8x4xbf16>
    %67 = vector.shape_cast %66 : vector<1x8x4xbf16> to vector<8x4xbf16>
    %cst_27 = arith.constant dense<0.000000e+00> : vector<8x256xf32>
    %68 = tpu.matmul %67, %65, %cst_27 {dimension_numbers = #tpu.dot_dimension_numbers<[1], [0], [0], [1], [0, 0, 1, 1], [], []>} : vector<8x4xbf16>, vector<4x256xbf16>, vector<8x256xf32> -> vector<8x256xf32>
    %69 = arith.addf %60, %68 : vector<8x256xf32>
    %c239_i32 = arith.constant 239 : i32
    %70 = tpu.dynamic_rotate %2 by %c239_i32 dim 1 : vector<4x256xf32>, i32 -> vector<4x256xf32>
    %71 = vector.extract_strided_slice %0 {offsets = [8, 0], sizes = [1, 256], strides = [1, 1]} : vector<9x256xf32> to vector<1x256xf32>
    %72 = vector.broadcast %71 : vector<1x256xf32> to vector<4x256xf32>
    %73 = arith.mulf %70, %72 : vector<4x256xf32>
    %74 = arith.truncf %73 : vector<4x256xf32> to vector<4x256xbf16>
    %c8 = arith.constant 8 : index
    %c0_28 = arith.constant 0 : index
    %c0_29 = arith.constant 0 : index
    %75 = vector.load %arg4[%c8, %c0_28, %c0_29] : memref<9x8x4xbf16, #tpu.memory_space<vmem>>, vector<1x8x4xbf16>
    %76 = vector.shape_cast %75 : vector<1x8x4xbf16> to vector<8x4xbf16>
    %cst_30 = arith.constant dense<0.000000e+00> : vector<8x256xf32>
    %77 = tpu.matmul %76, %74, %cst_30 {dimension_numbers = #tpu.dot_dimension_numbers<[1], [0], [0], [1], [0, 0, 1, 1], [], []>} : vector<8x4xbf16>, vector<4x256xbf16>, vector<8x256xf32> -> vector<8x256xf32>
    %78 = arith.addf %69, %77 : vector<8x256xf32>
    %c0_31 = arith.constant 0 : index
    %c0_32 = arith.constant 0 : index
    %79 = vector.load %arg9[%c0_31, %c0_32] : memref<8x5xf32, #tpu.memory_space<vmem>>, vector<8x1xf32>
    %80 = vector.broadcast %79 : vector<8x1xf32> to vector<8x256xf32>
    %81 = arith.addf %78, %80 : vector<8x256xf32>
    %cst_33 = arith.constant 0.000000e+00 : f32
    %82 = vector.broadcast %cst_33 : f32 to vector<8x256xf32>
    %83 = arith.maximumf %81, %82 : vector<8x256xf32>
    %84 = arith.truncf %83 : vector<8x256xf32> to vector<8x256xbf16>
    %c17_i32_34 = arith.constant 17 : i32
    %85 = tpu.dynamic_rotate %83 by %c17_i32_34 dim 1 : vector<8x256xf32>, i32 -> vector<8x256xf32>
    %86 = vector.extract_strided_slice %0 {offsets = [0, 0], sizes = [1, 256], strides = [1, 1]} : vector<9x256xf32> to vector<1x256xf32>
    %87 = vector.broadcast %86 : vector<1x256xf32> to vector<8x256xf32>
    %88 = arith.mulf %85, %87 : vector<8x256xf32>
    %89 = arith.truncf %88 : vector<8x256xf32> to vector<8x256xbf16>
    %c0_35 = arith.constant 0 : index
    %c0_36 = arith.constant 0 : index
    %c0_37 = arith.constant 0 : index
    %90 = vector.load %arg5[%c0_35, %c0_36, %c0_37] : memref<9x8x8xbf16, #tpu.memory_space<vmem>>, vector<1x8x8xbf16>
    %91 = vector.shape_cast %90 : vector<1x8x8xbf16> to vector<8x8xbf16>
    %cst_38 = arith.constant dense<0.000000e+00> : vector<8x256xf32>
    %92 = tpu.matmul %91, %89, %cst_38 {dimension_numbers = #tpu.dot_dimension_numbers<[1], [0], [0], [1], [0, 0, 1, 1], [], []>} : vector<8x8xbf16>, vector<8x256xbf16>, vector<8x256xf32> -> vector<8x256xf32>
    %c16_i32_39 = arith.constant 16 : i32
    %93 = tpu.dynamic_rotate %83 by %c16_i32_39 dim 1 : vector<8x256xf32>, i32 -> vector<8x256xf32>
    %94 = vector.extract_strided_slice %0 {offsets = [1, 0], sizes = [1, 256], strides = [1, 1]} : vector<9x256xf32> to vector<1x256xf32>
    %95 = vector.broadcast %94 : vector<1x256xf32> to vector<8x256xf32>
    %96 = arith.mulf %93, %95 : vector<8x256xf32>
    %97 = arith.truncf %96 : vector<8x256xf32> to vector<8x256xbf16>
    %c1_40 = arith.constant 1 : index
    %c0_41 = arith.constant 0 : index
    %c0_42 = arith.constant 0 : index
    %98 = vector.load %arg5[%c1_40, %c0_41, %c0_42] : memref<9x8x8xbf16, #tpu.memory_space<vmem>>, vector<1x8x8xbf16>
    %99 = vector.shape_cast %98 : vector<1x8x8xbf16> to vector<8x8xbf16>
    %cst_43 = arith.constant dense<0.000000e+00> : vector<8x256xf32>
    %100 = tpu.matmul %99, %97, %cst_43 {dimension_numbers = #tpu.dot_dimension_numbers<[1], [0], [0], [1], [0, 0, 1, 1], [], []>} : vector<8x8xbf16>, vector<8x256xbf16>, vector<8x256xf32> -> vector<8x256xf32>
    %101 = arith.addf %92, %100 : vector<8x256xf32>
    %c15_i32_44 = arith.constant 15 : i32
    %102 = tpu.dynamic_rotate %83 by %c15_i32_44 dim 1 : vector<8x256xf32>, i32 -> vector<8x256xf32>
    %103 = vector.extract_strided_slice %0 {offsets = [2, 0], sizes = [1, 256], strides = [1, 1]} : vector<9x256xf32> to vector<1x256xf32>
    %104 = vector.broadcast %103 : vector<1x256xf32> to vector<8x256xf32>
    %105 = arith.mulf %102, %104 : vector<8x256xf32>
    %106 = arith.truncf %105 : vector<8x256xf32> to vector<8x256xbf16>
    %c2_45 = arith.constant 2 : index
    %c0_46 = arith.constant 0 : index
    %c0_47 = arith.constant 0 : index
    %107 = vector.load %arg5[%c2_45, %c0_46, %c0_47] : memref<9x8x8xbf16, #tpu.memory_space<vmem>>, vector<1x8x8xbf16>
    %108 = vector.shape_cast %107 : vector<1x8x8xbf16> to vector<8x8xbf16>
    %cst_48 = arith.constant dense<0.000000e+00> : vector<8x256xf32>
    %109 = tpu.matmul %108, %106, %cst_48 {dimension_numbers = #tpu.dot_dimension_numbers<[1], [0], [0], [1], [0, 0, 1, 1], [], []>} : vector<8x8xbf16>, vector<8x256xbf16>, vector<8x256xf32> -> vector<8x256xf32>
    %110 = arith.addf %101, %109 : vector<8x256xf32>
    %c1_i32_49 = arith.constant 1 : i32
    %111 = tpu.dynamic_rotate %83 by %c1_i32_49 dim 1 : vector<8x256xf32>, i32 -> vector<8x256xf32>
    %112 = vector.extract_strided_slice %0 {offsets = [3, 0], sizes = [1, 256], strides = [1, 1]} : vector<9x256xf32> to vector<1x256xf32>
    %113 = vector.broadcast %112 : vector<1x256xf32> to vector<8x256xf32>
    %114 = arith.mulf %111, %113 : vector<8x256xf32>
    %115 = arith.truncf %114 : vector<8x256xf32> to vector<8x256xbf16>
    %c3_50 = arith.constant 3 : index
    %c0_51 = arith.constant 0 : index
    %c0_52 = arith.constant 0 : index
    %116 = vector.load %arg5[%c3_50, %c0_51, %c0_52] : memref<9x8x8xbf16, #tpu.memory_space<vmem>>, vector<1x8x8xbf16>
    %117 = vector.shape_cast %116 : vector<1x8x8xbf16> to vector<8x8xbf16>
    %cst_53 = arith.constant dense<0.000000e+00> : vector<8x256xf32>
    %118 = tpu.matmul %117, %115, %cst_53 {dimension_numbers = #tpu.dot_dimension_numbers<[1], [0], [0], [1], [0, 0, 1, 1], [], []>} : vector<8x8xbf16>, vector<8x256xbf16>, vector<8x256xf32> -> vector<8x256xf32>
    %119 = arith.addf %110, %118 : vector<8x256xf32>
    %c4_54 = arith.constant 4 : index
    %c0_55 = arith.constant 0 : index
    %c0_56 = arith.constant 0 : index
    %120 = vector.load %arg5[%c4_54, %c0_55, %c0_56] : memref<9x8x8xbf16, #tpu.memory_space<vmem>>, vector<1x8x8xbf16>
    %121 = vector.shape_cast %120 : vector<1x8x8xbf16> to vector<8x8xbf16>
    %cst_57 = arith.constant dense<0.000000e+00> : vector<8x256xf32>
    %122 = tpu.matmul %121, %84, %cst_57 {dimension_numbers = #tpu.dot_dimension_numbers<[1], [0], [0], [1], [0, 0, 1, 1], [], []>} : vector<8x8xbf16>, vector<8x256xbf16>, vector<8x256xf32> -> vector<8x256xf32>
    %123 = arith.addf %119, %122 : vector<8x256xf32>
    %c255_i32_58 = arith.constant 255 : i32
    %124 = tpu.dynamic_rotate %83 by %c255_i32_58 dim 1 : vector<8x256xf32>, i32 -> vector<8x256xf32>
    %125 = vector.extract_strided_slice %0 {offsets = [5, 0], sizes = [1, 256], strides = [1, 1]} : vector<9x256xf32> to vector<1x256xf32>
    %126 = vector.broadcast %125 : vector<1x256xf32> to vector<8x256xf32>
    %127 = arith.mulf %124, %126 : vector<8x256xf32>
    %128 = arith.truncf %127 : vector<8x256xf32> to vector<8x256xbf16>
    %c5_59 = arith.constant 5 : index
    %c0_60 = arith.constant 0 : index
    %c0_61 = arith.constant 0 : index
    %129 = vector.load %arg5[%c5_59, %c0_60, %c0_61] : memref<9x8x8xbf16, #tpu.memory_space<vmem>>, vector<1x8x8xbf16>
    %130 = vector.shape_cast %129 : vector<1x8x8xbf16> to vector<8x8xbf16>
    %cst_62 = arith.constant dense<0.000000e+00> : vector<8x256xf32>
    %131 = tpu.matmul %130, %128, %cst_62 {dimension_numbers = #tpu.dot_dimension_numbers<[1], [0], [0], [1], [0, 0, 1, 1], [], []>} : vector<8x8xbf16>, vector<8x256xbf16>, vector<8x256xf32> -> vector<8x256xf32>
    %132 = arith.addf %123, %131 : vector<8x256xf32>
    %c241_i32_63 = arith.constant 241 : i32
    %133 = tpu.dynamic_rotate %83 by %c241_i32_63 dim 1 : vector<8x256xf32>, i32 -> vector<8x256xf32>
    %134 = vector.extract_strided_slice %0 {offsets = [6, 0], sizes = [1, 256], strides = [1, 1]} : vector<9x256xf32> to vector<1x256xf32>
    %135 = vector.broadcast %134 : vector<1x256xf32> to vector<8x256xf32>
    %136 = arith.mulf %133, %135 : vector<8x256xf32>
    %137 = arith.truncf %136 : vector<8x256xf32> to vector<8x256xbf16>
    %c6_64 = arith.constant 6 : index
    %c0_65 = arith.constant 0 : index
    %c0_66 = arith.constant 0 : index
    %138 = vector.load %arg5[%c6_64, %c0_65, %c0_66] : memref<9x8x8xbf16, #tpu.memory_space<vmem>>, vector<1x8x8xbf16>
    %139 = vector.shape_cast %138 : vector<1x8x8xbf16> to vector<8x8xbf16>
    %cst_67 = arith.constant dense<0.000000e+00> : vector<8x256xf32>
    %140 = tpu.matmul %139, %137, %cst_67 {dimension_numbers = #tpu.dot_dimension_numbers<[1], [0], [0], [1], [0, 0, 1, 1], [], []>} : vector<8x8xbf16>, vector<8x256xbf16>, vector<8x256xf32> -> vector<8x256xf32>
    %141 = arith.addf %132, %140 : vector<8x256xf32>
    %c240_i32_68 = arith.constant 240 : i32
    %142 = tpu.dynamic_rotate %83 by %c240_i32_68 dim 1 : vector<8x256xf32>, i32 -> vector<8x256xf32>
    %143 = vector.extract_strided_slice %0 {offsets = [7, 0], sizes = [1, 256], strides = [1, 1]} : vector<9x256xf32> to vector<1x256xf32>
    %144 = vector.broadcast %143 : vector<1x256xf32> to vector<8x256xf32>
    %145 = arith.mulf %142, %144 : vector<8x256xf32>
    %146 = arith.truncf %145 : vector<8x256xf32> to vector<8x256xbf16>
    %c7_69 = arith.constant 7 : index
    %c0_70 = arith.constant 0 : index
    %c0_71 = arith.constant 0 : index
    %147 = vector.load %arg5[%c7_69, %c0_70, %c0_71] : memref<9x8x8xbf16, #tpu.memory_space<vmem>>, vector<1x8x8xbf16>
    %148 = vector.shape_cast %147 : vector<1x8x8xbf16> to vector<8x8xbf16>
    %cst_72 = arith.constant dense<0.000000e+00> : vector<8x256xf32>
    %149 = tpu.matmul %148, %146, %cst_72 {dimension_numbers = #tpu.dot_dimension_numbers<[1], [0], [0], [1], [0, 0, 1, 1], [], []>} : vector<8x8xbf16>, vector<8x256xbf16>, vector<8x256xf32> -> vector<8x256xf32>
    %150 = arith.addf %141, %149 : vector<8x256xf32>
    %c239_i32_73 = arith.constant 239 : i32
    %151 = tpu.dynamic_rotate %83 by %c239_i32_73 dim 1 : vector<8x256xf32>, i32 -> vector<8x256xf32>
    %152 = vector.extract_strided_slice %0 {offsets = [8, 0], sizes = [1, 256], strides = [1, 1]} : vector<9x256xf32> to vector<1x256xf32>
    %153 = vector.broadcast %152 : vector<1x256xf32> to vector<8x256xf32>
    %154 = arith.mulf %151, %153 : vector<8x256xf32>
    %155 = arith.truncf %154 : vector<8x256xf32> to vector<8x256xbf16>
    %c8_74 = arith.constant 8 : index
    %c0_75 = arith.constant 0 : index
    %c0_76 = arith.constant 0 : index
    %156 = vector.load %arg5[%c8_74, %c0_75, %c0_76] : memref<9x8x8xbf16, #tpu.memory_space<vmem>>, vector<1x8x8xbf16>
    %157 = vector.shape_cast %156 : vector<1x8x8xbf16> to vector<8x8xbf16>
    %cst_77 = arith.constant dense<0.000000e+00> : vector<8x256xf32>
    %158 = tpu.matmul %157, %155, %cst_77 {dimension_numbers = #tpu.dot_dimension_numbers<[1], [0], [0], [1], [0, 0, 1, 1], [], []>} : vector<8x8xbf16>, vector<8x256xbf16>, vector<8x256xf32> -> vector<8x256xf32>
    %159 = arith.addf %150, %158 : vector<8x256xf32>
    %c0_78 = arith.constant 0 : index
    %c1_79 = arith.constant 1 : index
    %160 = vector.load %arg9[%c0_78, %c1_79] : memref<8x5xf32, #tpu.memory_space<vmem>>, vector<8x1xf32>
    %161 = vector.broadcast %160 : vector<8x1xf32> to vector<8x256xf32>
    %162 = arith.addf %159, %161 : vector<8x256xf32>
    %cst_80 = arith.constant 0.000000e+00 : f32
    %163 = vector.broadcast %cst_80 : f32 to vector<8x256xf32>
    %164 = arith.maximumf %162, %163 : vector<8x256xf32>
    %165 = arith.truncf %164 : vector<8x256xf32> to vector<8x256xbf16>
    %c17_i32_81 = arith.constant 17 : i32
    %166 = tpu.dynamic_rotate %164 by %c17_i32_81 dim 1 : vector<8x256xf32>, i32 -> vector<8x256xf32>
    %167 = vector.extract_strided_slice %0 {offsets = [0, 0], sizes = [1, 256], strides = [1, 1]} : vector<9x256xf32> to vector<1x256xf32>
    %168 = vector.broadcast %167 : vector<1x256xf32> to vector<8x256xf32>
    %169 = arith.mulf %166, %168 : vector<8x256xf32>
    %170 = arith.truncf %169 : vector<8x256xf32> to vector<8x256xbf16>
    %c0_82 = arith.constant 0 : index
    %c0_83 = arith.constant 0 : index
    %c0_84 = arith.constant 0 : index
    %171 = vector.load %arg6[%c0_82, %c0_83, %c0_84] : memref<9x8x8xbf16, #tpu.memory_space<vmem>>, vector<1x8x8xbf16>
    %172 = vector.shape_cast %171 : vector<1x8x8xbf16> to vector<8x8xbf16>
    %cst_85 = arith.constant dense<0.000000e+00> : vector<8x256xf32>
    %173 = tpu.matmul %172, %170, %cst_85 {dimension_numbers = #tpu.dot_dimension_numbers<[1], [0], [0], [1], [0, 0, 1, 1], [], []>} : vector<8x8xbf16>, vector<8x256xbf16>, vector<8x256xf32> -> vector<8x256xf32>
    %c16_i32_86 = arith.constant 16 : i32
    %174 = tpu.dynamic_rotate %164 by %c16_i32_86 dim 1 : vector<8x256xf32>, i32 -> vector<8x256xf32>
    %175 = vector.extract_strided_slice %0 {offsets = [1, 0], sizes = [1, 256], strides = [1, 1]} : vector<9x256xf32> to vector<1x256xf32>
    %176 = vector.broadcast %175 : vector<1x256xf32> to vector<8x256xf32>
    %177 = arith.mulf %174, %176 : vector<8x256xf32>
    %178 = arith.truncf %177 : vector<8x256xf32> to vector<8x256xbf16>
    %c1_87 = arith.constant 1 : index
    %c0_88 = arith.constant 0 : index
    %c0_89 = arith.constant 0 : index
    %179 = vector.load %arg6[%c1_87, %c0_88, %c0_89] : memref<9x8x8xbf16, #tpu.memory_space<vmem>>, vector<1x8x8xbf16>
    %180 = vector.shape_cast %179 : vector<1x8x8xbf16> to vector<8x8xbf16>
    %cst_90 = arith.constant dense<0.000000e+00> : vector<8x256xf32>
    %181 = tpu.matmul %180, %178, %cst_90 {dimension_numbers = #tpu.dot_dimension_numbers<[1], [0], [0], [1], [0, 0, 1, 1], [], []>} : vector<8x8xbf16>, vector<8x256xbf16>, vector<8x256xf32> -> vector<8x256xf32>
    %182 = arith.addf %173, %181 : vector<8x256xf32>
    %c15_i32_91 = arith.constant 15 : i32
    %183 = tpu.dynamic_rotate %164 by %c15_i32_91 dim 1 : vector<8x256xf32>, i32 -> vector<8x256xf32>
    %184 = vector.extract_strided_slice %0 {offsets = [2, 0], sizes = [1, 256], strides = [1, 1]} : vector<9x256xf32> to vector<1x256xf32>
    %185 = vector.broadcast %184 : vector<1x256xf32> to vector<8x256xf32>
    %186 = arith.mulf %183, %185 : vector<8x256xf32>
    %187 = arith.truncf %186 : vector<8x256xf32> to vector<8x256xbf16>
    %c2_92 = arith.constant 2 : index
    %c0_93 = arith.constant 0 : index
    %c0_94 = arith.constant 0 : index
    %188 = vector.load %arg6[%c2_92, %c0_93, %c0_94] : memref<9x8x8xbf16, #tpu.memory_space<vmem>>, vector<1x8x8xbf16>
    %189 = vector.shape_cast %188 : vector<1x8x8xbf16> to vector<8x8xbf16>
    %cst_95 = arith.constant dense<0.000000e+00> : vector<8x256xf32>
    %190 = tpu.matmul %189, %187, %cst_95 {dimension_numbers = #tpu.dot_dimension_numbers<[1], [0], [0], [1], [0, 0, 1, 1], [], []>} : vector<8x8xbf16>, vector<8x256xbf16>, vector<8x256xf32> -> vector<8x256xf32>
    %191 = arith.addf %182, %190 : vector<8x256xf32>
    %c1_i32_96 = arith.constant 1 : i32
    %192 = tpu.dynamic_rotate %164 by %c1_i32_96 dim 1 : vector<8x256xf32>, i32 -> vector<8x256xf32>
    %193 = vector.extract_strided_slice %0 {offsets = [3, 0], sizes = [1, 256], strides = [1, 1]} : vector<9x256xf32> to vector<1x256xf32>
    %194 = vector.broadcast %193 : vector<1x256xf32> to vector<8x256xf32>
    %195 = arith.mulf %192, %194 : vector<8x256xf32>
    %196 = arith.truncf %195 : vector<8x256xf32> to vector<8x256xbf16>
    %c3_97 = arith.constant 3 : index
    %c0_98 = arith.constant 0 : index
    %c0_99 = arith.constant 0 : index
    %197 = vector.load %arg6[%c3_97, %c0_98, %c0_99] : memref<9x8x8xbf16, #tpu.memory_space<vmem>>, vector<1x8x8xbf16>
    %198 = vector.shape_cast %197 : vector<1x8x8xbf16> to vector<8x8xbf16>
    %cst_100 = arith.constant dense<0.000000e+00> : vector<8x256xf32>
    %199 = tpu.matmul %198, %196, %cst_100 {dimension_numbers = #tpu.dot_dimension_numbers<[1], [0], [0], [1], [0, 0, 1, 1], [], []>} : vector<8x8xbf16>, vector<8x256xbf16>, vector<8x256xf32> -> vector<8x256xf32>
    %200 = arith.addf %191, %199 : vector<8x256xf32>
    %c4_101 = arith.constant 4 : index
    %c0_102 = arith.constant 0 : index
    %c0_103 = arith.constant 0 : index
    %201 = vector.load %arg6[%c4_101, %c0_102, %c0_103] : memref<9x8x8xbf16, #tpu.memory_space<vmem>>, vector<1x8x8xbf16>
    %202 = vector.shape_cast %201 : vector<1x8x8xbf16> to vector<8x8xbf16>
    %cst_104 = arith.constant dense<0.000000e+00> : vector<8x256xf32>
    %203 = tpu.matmul %202, %165, %cst_104 {dimension_numbers = #tpu.dot_dimension_numbers<[1], [0], [0], [1], [0, 0, 1, 1], [], []>} : vector<8x8xbf16>, vector<8x256xbf16>, vector<8x256xf32> -> vector<8x256xf32>
    %204 = arith.addf %200, %203 : vector<8x256xf32>
    %c255_i32_105 = arith.constant 255 : i32
    %205 = tpu.dynamic_rotate %164 by %c255_i32_105 dim 1 : vector<8x256xf32>, i32 -> vector<8x256xf32>
    %206 = vector.extract_strided_slice %0 {offsets = [5, 0], sizes = [1, 256], strides = [1, 1]} : vector<9x256xf32> to vector<1x256xf32>
    %207 = vector.broadcast %206 : vector<1x256xf32> to vector<8x256xf32>
    %208 = arith.mulf %205, %207 : vector<8x256xf32>
    %209 = arith.truncf %208 : vector<8x256xf32> to vector<8x256xbf16>
    %c5_106 = arith.constant 5 : index
    %c0_107 = arith.constant 0 : index
    %c0_108 = arith.constant 0 : index
    %210 = vector.load %arg6[%c5_106, %c0_107, %c0_108] : memref<9x8x8xbf16, #tpu.memory_space<vmem>>, vector<1x8x8xbf16>
    %211 = vector.shape_cast %210 : vector<1x8x8xbf16> to vector<8x8xbf16>
    %cst_109 = arith.constant dense<0.000000e+00> : vector<8x256xf32>
    %212 = tpu.matmul %211, %209, %cst_109 {dimension_numbers = #tpu.dot_dimension_numbers<[1], [0], [0], [1], [0, 0, 1, 1], [], []>} : vector<8x8xbf16>, vector<8x256xbf16>, vector<8x256xf32> -> vector<8x256xf32>
    %213 = arith.addf %204, %212 : vector<8x256xf32>
    %c241_i32_110 = arith.constant 241 : i32
    %214 = tpu.dynamic_rotate %164 by %c241_i32_110 dim 1 : vector<8x256xf32>, i32 -> vector<8x256xf32>
    %215 = vector.extract_strided_slice %0 {offsets = [6, 0], sizes = [1, 256], strides = [1, 1]} : vector<9x256xf32> to vector<1x256xf32>
    %216 = vector.broadcast %215 : vector<1x256xf32> to vector<8x256xf32>
    %217 = arith.mulf %214, %216 : vector<8x256xf32>
    %218 = arith.truncf %217 : vector<8x256xf32> to vector<8x256xbf16>
    %c6_111 = arith.constant 6 : index
    %c0_112 = arith.constant 0 : index
    %c0_113 = arith.constant 0 : index
    %219 = vector.load %arg6[%c6_111, %c0_112, %c0_113] : memref<9x8x8xbf16, #tpu.memory_space<vmem>>, vector<1x8x8xbf16>
    %220 = vector.shape_cast %219 : vector<1x8x8xbf16> to vector<8x8xbf16>
    %cst_114 = arith.constant dense<0.000000e+00> : vector<8x256xf32>
    %221 = tpu.matmul %220, %218, %cst_114 {dimension_numbers = #tpu.dot_dimension_numbers<[1], [0], [0], [1], [0, 0, 1, 1], [], []>} : vector<8x8xbf16>, vector<8x256xbf16>, vector<8x256xf32> -> vector<8x256xf32>
    %222 = arith.addf %213, %221 : vector<8x256xf32>
    %c240_i32_115 = arith.constant 240 : i32
    %223 = tpu.dynamic_rotate %164 by %c240_i32_115 dim 1 : vector<8x256xf32>, i32 -> vector<8x256xf32>
    %224 = vector.extract_strided_slice %0 {offsets = [7, 0], sizes = [1, 256], strides = [1, 1]} : vector<9x256xf32> to vector<1x256xf32>
    %225 = vector.broadcast %224 : vector<1x256xf32> to vector<8x256xf32>
    %226 = arith.mulf %223, %225 : vector<8x256xf32>
    %227 = arith.truncf %226 : vector<8x256xf32> to vector<8x256xbf16>
    %c7_116 = arith.constant 7 : index
    %c0_117 = arith.constant 0 : index
    %c0_118 = arith.constant 0 : index
    %228 = vector.load %arg6[%c7_116, %c0_117, %c0_118] : memref<9x8x8xbf16, #tpu.memory_space<vmem>>, vector<1x8x8xbf16>
    %229 = vector.shape_cast %228 : vector<1x8x8xbf16> to vector<8x8xbf16>
    %cst_119 = arith.constant dense<0.000000e+00> : vector<8x256xf32>
    %230 = tpu.matmul %229, %227, %cst_119 {dimension_numbers = #tpu.dot_dimension_numbers<[1], [0], [0], [1], [0, 0, 1, 1], [], []>} : vector<8x8xbf16>, vector<8x256xbf16>, vector<8x256xf32> -> vector<8x256xf32>
    %231 = arith.addf %222, %230 : vector<8x256xf32>
    %c239_i32_120 = arith.constant 239 : i32
    %232 = tpu.dynamic_rotate %164 by %c239_i32_120 dim 1 : vector<8x256xf32>, i32 -> vector<8x256xf32>
    %233 = vector.extract_strided_slice %0 {offsets = [8, 0], sizes = [1, 256], strides = [1, 1]} : vector<9x256xf32> to vector<1x256xf32>
    %234 = vector.broadcast %233 : vector<1x256xf32> to vector<8x256xf32>
    %235 = arith.mulf %232, %234 : vector<8x256xf32>
    %236 = arith.truncf %235 : vector<8x256xf32> to vector<8x256xbf16>
    %c8_121 = arith.constant 8 : index
    %c0_122 = arith.constant 0 : index
    %c0_123 = arith.constant 0 : index
    %237 = vector.load %arg6[%c8_121, %c0_122, %c0_123] : memref<9x8x8xbf16, #tpu.memory_space<vmem>>, vector<1x8x8xbf16>
    %238 = vector.shape_cast %237 : vector<1x8x8xbf16> to vector<8x8xbf16>
    %cst_124 = arith.constant dense<0.000000e+00> : vector<8x256xf32>
    %239 = tpu.matmul %238, %236, %cst_124 {dimension_numbers = #tpu.dot_dimension_numbers<[1], [0], [0], [1], [0, 0, 1, 1], [], []>} : vector<8x8xbf16>, vector<8x256xbf16>, vector<8x256xf32> -> vector<8x256xf32>
    %240 = arith.addf %231, %239 : vector<8x256xf32>
    %c0_125 = arith.constant 0 : index
    %c2_126 = arith.constant 2 : index
    %241 = vector.load %arg9[%c0_125, %c2_126] : memref<8x5xf32, #tpu.memory_space<vmem>>, vector<8x1xf32>
    %242 = vector.broadcast %241 : vector<8x1xf32> to vector<8x256xf32>
    %243 = arith.addf %240, %242 : vector<8x256xf32>
    %244 = arith.addf %81, %243 : vector<8x256xf32>
    %c0_127 = arith.constant 0 : index
    %c0_128 = arith.constant 0 : index
    %c0_129 = arith.constant 0 : index
    %245 = vector.load %arg2[%c0_127, %c0_128, %c0_129] : memref<1x8x256xf32, #tpu.memory_space<vmem>>, vector<1x8x256xf32>
    %246 = vector.shape_cast %245 : vector<1x8x256xf32> to vector<8x256xf32>
    %247 = arith.addf %244, %246 : vector<8x256xf32>
    %cst_130 = arith.constant 0.000000e+00 : f32
    %248 = vector.broadcast %cst_130 : f32 to vector<8x256xf32>
    %249 = arith.maximumf %247, %248 : vector<8x256xf32>
    %250 = arith.truncf %249 : vector<8x256xf32> to vector<8x256xbf16>
    %c17_i32_131 = arith.constant 17 : i32
    %251 = tpu.dynamic_rotate %249 by %c17_i32_131 dim 1 : vector<8x256xf32>, i32 -> vector<8x256xf32>
    %252 = vector.extract_strided_slice %0 {offsets = [0, 0], sizes = [1, 256], strides = [1, 1]} : vector<9x256xf32> to vector<1x256xf32>
    %253 = vector.broadcast %252 : vector<1x256xf32> to vector<8x256xf32>
    %254 = arith.mulf %251, %253 : vector<8x256xf32>
    %255 = arith.truncf %254 : vector<8x256xf32> to vector<8x256xbf16>
    %c0_132 = arith.constant 0 : index
    %c0_133 = arith.constant 0 : index
    %c0_134 = arith.constant 0 : index
    %256 = vector.load %arg7[%c0_132, %c0_133, %c0_134] : memref<9x8x8xbf16, #tpu.memory_space<vmem>>, vector<1x8x8xbf16>
    %257 = vector.shape_cast %256 : vector<1x8x8xbf16> to vector<8x8xbf16>
    %cst_135 = arith.constant dense<0.000000e+00> : vector<8x256xf32>
    %258 = tpu.matmul %257, %255, %cst_135 {dimension_numbers = #tpu.dot_dimension_numbers<[1], [0], [0], [1], [0, 0, 1, 1], [], []>} : vector<8x8xbf16>, vector<8x256xbf16>, vector<8x256xf32> -> vector<8x256xf32>
    %c16_i32_136 = arith.constant 16 : i32
    %259 = tpu.dynamic_rotate %249 by %c16_i32_136 dim 1 : vector<8x256xf32>, i32 -> vector<8x256xf32>
    %260 = vector.extract_strided_slice %0 {offsets = [1, 0], sizes = [1, 256], strides = [1, 1]} : vector<9x256xf32> to vector<1x256xf32>
    %261 = vector.broadcast %260 : vector<1x256xf32> to vector<8x256xf32>
    %262 = arith.mulf %259, %261 : vector<8x256xf32>
    %263 = arith.truncf %262 : vector<8x256xf32> to vector<8x256xbf16>
    %c1_137 = arith.constant 1 : index
    %c0_138 = arith.constant 0 : index
    %c0_139 = arith.constant 0 : index
    %264 = vector.load %arg7[%c1_137, %c0_138, %c0_139] : memref<9x8x8xbf16, #tpu.memory_space<vmem>>, vector<1x8x8xbf16>
    %265 = vector.shape_cast %264 : vector<1x8x8xbf16> to vector<8x8xbf16>
    %cst_140 = arith.constant dense<0.000000e+00> : vector<8x256xf32>
    %266 = tpu.matmul %265, %263, %cst_140 {dimension_numbers = #tpu.dot_dimension_numbers<[1], [0], [0], [1], [0, 0, 1, 1], [], []>} : vector<8x8xbf16>, vector<8x256xbf16>, vector<8x256xf32> -> vector<8x256xf32>
    %267 = arith.addf %258, %266 : vector<8x256xf32>
    %c15_i32_141 = arith.constant 15 : i32
    %268 = tpu.dynamic_rotate %249 by %c15_i32_141 dim 1 : vector<8x256xf32>, i32 -> vector<8x256xf32>
    %269 = vector.extract_strided_slice %0 {offsets = [2, 0], sizes = [1, 256], strides = [1, 1]} : vector<9x256xf32> to vector<1x256xf32>
    %270 = vector.broadcast %269 : vector<1x256xf32> to vector<8x256xf32>
    %271 = arith.mulf %268, %270 : vector<8x256xf32>
    %272 = arith.truncf %271 : vector<8x256xf32> to vector<8x256xbf16>
    %c2_142 = arith.constant 2 : index
    %c0_143 = arith.constant 0 : index
    %c0_144 = arith.constant 0 : index
    %273 = vector.load %arg7[%c2_142, %c0_143, %c0_144] : memref<9x8x8xbf16, #tpu.memory_space<vmem>>, vector<1x8x8xbf16>
    %274 = vector.shape_cast %273 : vector<1x8x8xbf16> to vector<8x8xbf16>
    %cst_145 = arith.constant dense<0.000000e+00> : vector<8x256xf32>
    %275 = tpu.matmul %274, %272, %cst_145 {dimension_numbers = #tpu.dot_dimension_numbers<[1], [0], [0], [1], [0, 0, 1, 1], [], []>} : vector<8x8xbf16>, vector<8x256xbf16>, vector<8x256xf32> -> vector<8x256xf32>
    %276 = arith.addf %267, %275 : vector<8x256xf32>
    %c1_i32_146 = arith.constant 1 : i32
    %277 = tpu.dynamic_rotate %249 by %c1_i32_146 dim 1 : vector<8x256xf32>, i32 -> vector<8x256xf32>
    %278 = vector.extract_strided_slice %0 {offsets = [3, 0], sizes = [1, 256], strides = [1, 1]} : vector<9x256xf32> to vector<1x256xf32>
    %279 = vector.broadcast %278 : vector<1x256xf32> to vector<8x256xf32>
    %280 = arith.mulf %277, %279 : vector<8x256xf32>
    %281 = arith.truncf %280 : vector<8x256xf32> to vector<8x256xbf16>
    %c3_147 = arith.constant 3 : index
    %c0_148 = arith.constant 0 : index
    %c0_149 = arith.constant 0 : index
    %282 = vector.load %arg7[%c3_147, %c0_148, %c0_149] : memref<9x8x8xbf16, #tpu.memory_space<vmem>>, vector<1x8x8xbf16>
    %283 = vector.shape_cast %282 : vector<1x8x8xbf16> to vector<8x8xbf16>
    %cst_150 = arith.constant dense<0.000000e+00> : vector<8x256xf32>
    %284 = tpu.matmul %283, %281, %cst_150 {dimension_numbers = #tpu.dot_dimension_numbers<[1], [0], [0], [1], [0, 0, 1, 1], [], []>} : vector<8x8xbf16>, vector<8x256xbf16>, vector<8x256xf32> -> vector<8x256xf32>
    %285 = arith.addf %276, %284 : vector<8x256xf32>
    %c4_151 = arith.constant 4 : index
    %c0_152 = arith.constant 0 : index
    %c0_153 = arith.constant 0 : index
    %286 = vector.load %arg7[%c4_151, %c0_152, %c0_153] : memref<9x8x8xbf16, #tpu.memory_space<vmem>>, vector<1x8x8xbf16>
    %287 = vector.shape_cast %286 : vector<1x8x8xbf16> to vector<8x8xbf16>
    %cst_154 = arith.constant dense<0.000000e+00> : vector<8x256xf32>
    %288 = tpu.matmul %287, %250, %cst_154 {dimension_numbers = #tpu.dot_dimension_numbers<[1], [0], [0], [1], [0, 0, 1, 1], [], []>} : vector<8x8xbf16>, vector<8x256xbf16>, vector<8x256xf32> -> vector<8x256xf32>
    %289 = arith.addf %285, %288 : vector<8x256xf32>
    %c255_i32_155 = arith.constant 255 : i32
    %290 = tpu.dynamic_rotate %249 by %c255_i32_155 dim 1 : vector<8x256xf32>, i32 -> vector<8x256xf32>
    %291 = vector.extract_strided_slice %0 {offsets = [5, 0], sizes = [1, 256], strides = [1, 1]} : vector<9x256xf32> to vector<1x256xf32>
    %292 = vector.broadcast %291 : vector<1x256xf32> to vector<8x256xf32>
    %293 = arith.mulf %290, %292 : vector<8x256xf32>
    %294 = arith.truncf %293 : vector<8x256xf32> to vector<8x256xbf16>
    %c5_156 = arith.constant 5 : index
    %c0_157 = arith.constant 0 : index
    %c0_158 = arith.constant 0 : index
    %295 = vector.load %arg7[%c5_156, %c0_157, %c0_158] : memref<9x8x8xbf16, #tpu.memory_space<vmem>>, vector<1x8x8xbf16>
    %296 = vector.shape_cast %295 : vector<1x8x8xbf16> to vector<8x8xbf16>
    %cst_159 = arith.constant dense<0.000000e+00> : vector<8x256xf32>
    %297 = tpu.matmul %296, %294, %cst_159 {dimension_numbers = #tpu.dot_dimension_numbers<[1], [0], [0], [1], [0, 0, 1, 1], [], []>} : vector<8x8xbf16>, vector<8x256xbf16>, vector<8x256xf32> -> vector<8x256xf32>
    %298 = arith.addf %289, %297 : vector<8x256xf32>
    %c241_i32_160 = arith.constant 241 : i32
    %299 = tpu.dynamic_rotate %249 by %c241_i32_160 dim 1 : vector<8x256xf32>, i32 -> vector<8x256xf32>
    %300 = vector.extract_strided_slice %0 {offsets = [6, 0], sizes = [1, 256], strides = [1, 1]} : vector<9x256xf32> to vector<1x256xf32>
    %301 = vector.broadcast %300 : vector<1x256xf32> to vector<8x256xf32>
    %302 = arith.mulf %299, %301 : vector<8x256xf32>
    %303 = arith.truncf %302 : vector<8x256xf32> to vector<8x256xbf16>
    %c6_161 = arith.constant 6 : index
    %c0_162 = arith.constant 0 : index
    %c0_163 = arith.constant 0 : index
    %304 = vector.load %arg7[%c6_161, %c0_162, %c0_163] : memref<9x8x8xbf16, #tpu.memory_space<vmem>>, vector<1x8x8xbf16>
    %305 = vector.shape_cast %304 : vector<1x8x8xbf16> to vector<8x8xbf16>
    %cst_164 = arith.constant dense<0.000000e+00> : vector<8x256xf32>
    %306 = tpu.matmul %305, %303, %cst_164 {dimension_numbers = #tpu.dot_dimension_numbers<[1], [0], [0], [1], [0, 0, 1, 1], [], []>} : vector<8x8xbf16>, vector<8x256xbf16>, vector<8x256xf32> -> vector<8x256xf32>
    %307 = arith.addf %298, %306 : vector<8x256xf32>
    %c240_i32_165 = arith.constant 240 : i32
    %308 = tpu.dynamic_rotate %249 by %c240_i32_165 dim 1 : vector<8x256xf32>, i32 -> vector<8x256xf32>
    %309 = vector.extract_strided_slice %0 {offsets = [7, 0], sizes = [1, 256], strides = [1, 1]} : vector<9x256xf32> to vector<1x256xf32>
    %310 = vector.broadcast %309 : vector<1x256xf32> to vector<8x256xf32>
    %311 = arith.mulf %308, %310 : vector<8x256xf32>
    %312 = arith.truncf %311 : vector<8x256xf32> to vector<8x256xbf16>
    %c7_166 = arith.constant 7 : index
    %c0_167 = arith.constant 0 : index
    %c0_168 = arith.constant 0 : index
    %313 = vector.load %arg7[%c7_166, %c0_167, %c0_168] : memref<9x8x8xbf16, #tpu.memory_space<vmem>>, vector<1x8x8xbf16>
    %314 = vector.shape_cast %313 : vector<1x8x8xbf16> to vector<8x8xbf16>
    %cst_169 = arith.constant dense<0.000000e+00> : vector<8x256xf32>
    %315 = tpu.matmul %314, %312, %cst_169 {dimension_numbers = #tpu.dot_dimension_numbers<[1], [0], [0], [1], [0, 0, 1, 1], [], []>} : vector<8x8xbf16>, vector<8x256xbf16>, vector<8x256xf32> -> vector<8x256xf32>
    %316 = arith.addf %307, %315 : vector<8x256xf32>
    %c239_i32_170 = arith.constant 239 : i32
    %317 = tpu.dynamic_rotate %249 by %c239_i32_170 dim 1 : vector<8x256xf32>, i32 -> vector<8x256xf32>
    %318 = vector.extract_strided_slice %0 {offsets = [8, 0], sizes = [1, 256], strides = [1, 1]} : vector<9x256xf32> to vector<1x256xf32>
    %319 = vector.broadcast %318 : vector<1x256xf32> to vector<8x256xf32>
    %320 = arith.mulf %317, %319 : vector<8x256xf32>
    %321 = arith.truncf %320 : vector<8x256xf32> to vector<8x256xbf16>
    %c8_171 = arith.constant 8 : index
    %c0_172 = arith.constant 0 : index
    %c0_173 = arith.constant 0 : index
    %322 = vector.load %arg7[%c8_171, %c0_172, %c0_173] : memref<9x8x8xbf16, #tpu.memory_space<vmem>>, vector<1x8x8xbf16>
    %323 = vector.shape_cast %322 : vector<1x8x8xbf16> to vector<8x8xbf16>
    %cst_174 = arith.constant dense<0.000000e+00> : vector<8x256xf32>
    %324 = tpu.matmul %323, %321, %cst_174 {dimension_numbers = #tpu.dot_dimension_numbers<[1], [0], [0], [1], [0, 0, 1, 1], [], []>} : vector<8x8xbf16>, vector<8x256xbf16>, vector<8x256xf32> -> vector<8x256xf32>
    %325 = arith.addf %316, %324 : vector<8x256xf32>
    %c0_175 = arith.constant 0 : index
    %c3_176 = arith.constant 3 : index
    %326 = vector.load %arg9[%c0_175, %c3_176] : memref<8x5xf32, #tpu.memory_space<vmem>>, vector<8x1xf32>
    %327 = vector.broadcast %326 : vector<8x1xf32> to vector<8x256xf32>
    %328 = arith.addf %325, %327 : vector<8x256xf32>
    %cst_177 = arith.constant 0.000000e+00 : f32
    %329 = vector.broadcast %cst_177 : f32 to vector<8x256xf32>
    %330 = arith.maximumf %328, %329 : vector<8x256xf32>
    %331 = arith.truncf %330 : vector<8x256xf32> to vector<8x256xbf16>
    %c17_i32_178 = arith.constant 17 : i32
    %332 = tpu.dynamic_rotate %330 by %c17_i32_178 dim 1 : vector<8x256xf32>, i32 -> vector<8x256xf32>
    %333 = vector.extract_strided_slice %0 {offsets = [0, 0], sizes = [1, 256], strides = [1, 1]} : vector<9x256xf32> to vector<1x256xf32>
    %334 = vector.broadcast %333 : vector<1x256xf32> to vector<8x256xf32>
    %335 = arith.mulf %332, %334 : vector<8x256xf32>
    %336 = arith.truncf %335 : vector<8x256xf32> to vector<8x256xbf16>
    %c0_179 = arith.constant 0 : index
    %c0_180 = arith.constant 0 : index
    %c0_181 = arith.constant 0 : index
    %337 = vector.load %arg8[%c0_179, %c0_180, %c0_181] : memref<9x8x8xbf16, #tpu.memory_space<vmem>>, vector<1x8x8xbf16>
    %338 = vector.shape_cast %337 : vector<1x8x8xbf16> to vector<8x8xbf16>
    %cst_182 = arith.constant dense<0.000000e+00> : vector<8x256xf32>
    %339 = tpu.matmul %338, %336, %cst_182 {dimension_numbers = #tpu.dot_dimension_numbers<[1], [0], [0], [1], [0, 0, 1, 1], [], []>} : vector<8x8xbf16>, vector<8x256xbf16>, vector<8x256xf32> -> vector<8x256xf32>
    %c16_i32_183 = arith.constant 16 : i32
    %340 = tpu.dynamic_rotate %330 by %c16_i32_183 dim 1 : vector<8x256xf32>, i32 -> vector<8x256xf32>
    %341 = vector.extract_strided_slice %0 {offsets = [1, 0], sizes = [1, 256], strides = [1, 1]} : vector<9x256xf32> to vector<1x256xf32>
    %342 = vector.broadcast %341 : vector<1x256xf32> to vector<8x256xf32>
    %343 = arith.mulf %340, %342 : vector<8x256xf32>
    %344 = arith.truncf %343 : vector<8x256xf32> to vector<8x256xbf16>
    %c1_184 = arith.constant 1 : index
    %c0_185 = arith.constant 0 : index
    %c0_186 = arith.constant 0 : index
    %345 = vector.load %arg8[%c1_184, %c0_185, %c0_186] : memref<9x8x8xbf16, #tpu.memory_space<vmem>>, vector<1x8x8xbf16>
    %346 = vector.shape_cast %345 : vector<1x8x8xbf16> to vector<8x8xbf16>
    %cst_187 = arith.constant dense<0.000000e+00> : vector<8x256xf32>
    %347 = tpu.matmul %346, %344, %cst_187 {dimension_numbers = #tpu.dot_dimension_numbers<[1], [0], [0], [1], [0, 0, 1, 1], [], []>} : vector<8x8xbf16>, vector<8x256xbf16>, vector<8x256xf32> -> vector<8x256xf32>
    %348 = arith.addf %339, %347 : vector<8x256xf32>
    %c15_i32_188 = arith.constant 15 : i32
    %349 = tpu.dynamic_rotate %330 by %c15_i32_188 dim 1 : vector<8x256xf32>, i32 -> vector<8x256xf32>
    %350 = vector.extract_strided_slice %0 {offsets = [2, 0], sizes = [1, 256], strides = [1, 1]} : vector<9x256xf32> to vector<1x256xf32>
    %351 = vector.broadcast %350 : vector<1x256xf32> to vector<8x256xf32>
    %352 = arith.mulf %349, %351 : vector<8x256xf32>
    %353 = arith.truncf %352 : vector<8x256xf32> to vector<8x256xbf16>
    %c2_189 = arith.constant 2 : index
    %c0_190 = arith.constant 0 : index
    %c0_191 = arith.constant 0 : index
    %354 = vector.load %arg8[%c2_189, %c0_190, %c0_191] : memref<9x8x8xbf16, #tpu.memory_space<vmem>>, vector<1x8x8xbf16>
    %355 = vector.shape_cast %354 : vector<1x8x8xbf16> to vector<8x8xbf16>
    %cst_192 = arith.constant dense<0.000000e+00> : vector<8x256xf32>
    %356 = tpu.matmul %355, %353, %cst_192 {dimension_numbers = #tpu.dot_dimension_numbers<[1], [0], [0], [1], [0, 0, 1, 1], [], []>} : vector<8x8xbf16>, vector<8x256xbf16>, vector<8x256xf32> -> vector<8x256xf32>
    %357 = arith.addf %348, %356 : vector<8x256xf32>
    %c1_i32_193 = arith.constant 1 : i32
    %358 = tpu.dynamic_rotate %330 by %c1_i32_193 dim 1 : vector<8x256xf32>, i32 -> vector<8x256xf32>
    %359 = vector.extract_strided_slice %0 {offsets = [3, 0], sizes = [1, 256], strides = [1, 1]} : vector<9x256xf32> to vector<1x256xf32>
    %360 = vector.broadcast %359 : vector<1x256xf32> to vector<8x256xf32>
    %361 = arith.mulf %358, %360 : vector<8x256xf32>
    %362 = arith.truncf %361 : vector<8x256xf32> to vector<8x256xbf16>
    %c3_194 = arith.constant 3 : index
    %c0_195 = arith.constant 0 : index
    %c0_196 = arith.constant 0 : index
    %363 = vector.load %arg8[%c3_194, %c0_195, %c0_196] : memref<9x8x8xbf16, #tpu.memory_space<vmem>>, vector<1x8x8xbf16>
    %364 = vector.shape_cast %363 : vector<1x8x8xbf16> to vector<8x8xbf16>
    %cst_197 = arith.constant dense<0.000000e+00> : vector<8x256xf32>
    %365 = tpu.matmul %364, %362, %cst_197 {dimension_numbers = #tpu.dot_dimension_numbers<[1], [0], [0], [1], [0, 0, 1, 1], [], []>} : vector<8x8xbf16>, vector<8x256xbf16>, vector<8x256xf32> -> vector<8x256xf32>
    %366 = arith.addf %357, %365 : vector<8x256xf32>
    %c4_198 = arith.constant 4 : index
    %c0_199 = arith.constant 0 : index
    %c0_200 = arith.constant 0 : index
    %367 = vector.load %arg8[%c4_198, %c0_199, %c0_200] : memref<9x8x8xbf16, #tpu.memory_space<vmem>>, vector<1x8x8xbf16>
    %368 = vector.shape_cast %367 : vector<1x8x8xbf16> to vector<8x8xbf16>
    %cst_201 = arith.constant dense<0.000000e+00> : vector<8x256xf32>
    %369 = tpu.matmul %368, %331, %cst_201 {dimension_numbers = #tpu.dot_dimension_numbers<[1], [0], [0], [1], [0, 0, 1, 1], [], []>} : vector<8x8xbf16>, vector<8x256xbf16>, vector<8x256xf32> -> vector<8x256xf32>
    %370 = arith.addf %366, %369 : vector<8x256xf32>
    %c255_i32_202 = arith.constant 255 : i32
    %371 = tpu.dynamic_rotate %330 by %c255_i32_202 dim 1 : vector<8x256xf32>, i32 -> vector<8x256xf32>
    %372 = vector.extract_strided_slice %0 {offsets = [5, 0], sizes = [1, 256], strides = [1, 1]} : vector<9x256xf32> to vector<1x256xf32>
    %373 = vector.broadcast %372 : vector<1x256xf32> to vector<8x256xf32>
    %374 = arith.mulf %371, %373 : vector<8x256xf32>
    %375 = arith.truncf %374 : vector<8x256xf32> to vector<8x256xbf16>
    %c5_203 = arith.constant 5 : index
    %c0_204 = arith.constant 0 : index
    %c0_205 = arith.constant 0 : index
    %376 = vector.load %arg8[%c5_203, %c0_204, %c0_205] : memref<9x8x8xbf16, #tpu.memory_space<vmem>>, vector<1x8x8xbf16>
    %377 = vector.shape_cast %376 : vector<1x8x8xbf16> to vector<8x8xbf16>
    %cst_206 = arith.constant dense<0.000000e+00> : vector<8x256xf32>
    %378 = tpu.matmul %377, %375, %cst_206 {dimension_numbers = #tpu.dot_dimension_numbers<[1], [0], [0], [1], [0, 0, 1, 1], [], []>} : vector<8x8xbf16>, vector<8x256xbf16>, vector<8x256xf32> -> vector<8x256xf32>
    %379 = arith.addf %370, %378 : vector<8x256xf32>
    %c241_i32_207 = arith.constant 241 : i32
    %380 = tpu.dynamic_rotate %330 by %c241_i32_207 dim 1 : vector<8x256xf32>, i32 -> vector<8x256xf32>
    %381 = vector.extract_strided_slice %0 {offsets = [6, 0], sizes = [1, 256], strides = [1, 1]} : vector<9x256xf32> to vector<1x256xf32>
    %382 = vector.broadcast %381 : vector<1x256xf32> to vector<8x256xf32>
    %383 = arith.mulf %380, %382 : vector<8x256xf32>
    %384 = arith.truncf %383 : vector<8x256xf32> to vector<8x256xbf16>
    %c6_208 = arith.constant 6 : index
    %c0_209 = arith.constant 0 : index
    %c0_210 = arith.constant 0 : index
    %385 = vector.load %arg8[%c6_208, %c0_209, %c0_210] : memref<9x8x8xbf16, #tpu.memory_space<vmem>>, vector<1x8x8xbf16>
    %386 = vector.shape_cast %385 : vector<1x8x8xbf16> to vector<8x8xbf16>
    %cst_211 = arith.constant dense<0.000000e+00> : vector<8x256xf32>
    %387 = tpu.matmul %386, %384, %cst_211 {dimension_numbers = #tpu.dot_dimension_numbers<[1], [0], [0], [1], [0, 0, 1, 1], [], []>} : vector<8x8xbf16>, vector<8x256xbf16>, vector<8x256xf32> -> vector<8x256xf32>
    %388 = arith.addf %379, %387 : vector<8x256xf32>
    %c240_i32_212 = arith.constant 240 : i32
    %389 = tpu.dynamic_rotate %330 by %c240_i32_212 dim 1 : vector<8x256xf32>, i32 -> vector<8x256xf32>
    %390 = vector.extract_strided_slice %0 {offsets = [7, 0], sizes = [1, 256], strides = [1, 1]} : vector<9x256xf32> to vector<1x256xf32>
    %391 = vector.broadcast %390 : vector<1x256xf32> to vector<8x256xf32>
    %392 = arith.mulf %389, %391 : vector<8x256xf32>
    %393 = arith.truncf %392 : vector<8x256xf32> to vector<8x256xbf16>
    %c7_213 = arith.constant 7 : index
    %c0_214 = arith.constant 0 : index
    %c0_215 = arith.constant 0 : index
    %394 = vector.load %arg8[%c7_213, %c0_214, %c0_215] : memref<9x8x8xbf16, #tpu.memory_space<vmem>>, vector<1x8x8xbf16>
    %395 = vector.shape_cast %394 : vector<1x8x8xbf16> to vector<8x8xbf16>
    %cst_216 = arith.constant dense<0.000000e+00> : vector<8x256xf32>
    %396 = tpu.matmul %395, %393, %cst_216 {dimension_numbers = #tpu.dot_dimension_numbers<[1], [0], [0], [1], [0, 0, 1, 1], [], []>} : vector<8x8xbf16>, vector<8x256xbf16>, vector<8x256xf32> -> vector<8x256xf32>
    %397 = arith.addf %388, %396 : vector<8x256xf32>
    %c239_i32_217 = arith.constant 239 : i32
    %398 = tpu.dynamic_rotate %330 by %c239_i32_217 dim 1 : vector<8x256xf32>, i32 -> vector<8x256xf32>
    %399 = vector.extract_strided_slice %0 {offsets = [8, 0], sizes = [1, 256], strides = [1, 1]} : vector<9x256xf32> to vector<1x256xf32>
    %400 = vector.broadcast %399 : vector<1x256xf32> to vector<8x256xf32>
    %401 = arith.mulf %398, %400 : vector<8x256xf32>
    %402 = arith.truncf %401 : vector<8x256xf32> to vector<8x256xbf16>
    %c8_218 = arith.constant 8 : index
    %c0_219 = arith.constant 0 : index
    %c0_220 = arith.constant 0 : index
    %403 = vector.load %arg8[%c8_218, %c0_219, %c0_220] : memref<9x8x8xbf16, #tpu.memory_space<vmem>>, vector<1x8x8xbf16>
    %404 = vector.shape_cast %403 : vector<1x8x8xbf16> to vector<8x8xbf16>
    %cst_221 = arith.constant dense<0.000000e+00> : vector<8x256xf32>
    %405 = tpu.matmul %404, %402, %cst_221 {dimension_numbers = #tpu.dot_dimension_numbers<[1], [0], [0], [1], [0, 0, 1, 1], [], []>} : vector<8x8xbf16>, vector<8x256xbf16>, vector<8x256xf32> -> vector<8x256xf32>
    %406 = arith.addf %397, %405 : vector<8x256xf32>
    %c0_222 = arith.constant 0 : index
    %c4_223 = arith.constant 4 : index
    %407 = vector.load %arg9[%c0_222, %c4_223] : memref<8x5xf32, #tpu.memory_space<vmem>>, vector<8x1xf32>
    %408 = vector.broadcast %407 : vector<8x1xf32> to vector<8x256xf32>
    %409 = arith.addf %406, %408 : vector<8x256xf32>
    %410 = arith.addf %247, %409 : vector<8x256xf32>
    %c0_224 = arith.constant 0 : index
    %c0_225 = arith.constant 0 : index
    %c0_226 = arith.constant 0 : index
    %411 = vector.load %arg10[%c0_224, %c0_225, %c0_226] : memref<1x8x256xf32, #tpu.memory_space<vmem>>, vector<1x8x256xf32>
    %412 = vector.shape_cast %411 : vector<1x8x256xf32> to vector<8x256xf32>
    %413 = vector.shape_cast %410 : vector<8x256xf32> to vector<1x8x256xf32>
    tpu.vector_store %arg10[%c0_224, %c0_225, %c0_226], %413 {strides = array<i32>} : memref<1x8x256xf32, #tpu.memory_space<vmem>>, vector<1x8x256xf32>,
    return
  }
  func.func @transform_0(%arg0: i32) -> (i32, i32, i32) {
    %c0_i32 = arith.constant 0 : i32
    %c0_i32_0 = arith.constant 0 : i32
    %c0_i32_1 = arith.constant 0 : i32
    return %arg0, %c0_i32, %c0_i32_0 : i32, i32, i32
  }
  func.func @transform_1(%arg0: i32) -> (i32, i32, i32) {
    %c0_i32 = arith.constant 0 : i32
    %c0_i32_0 = arith.constant 0 : i32
    %c0_i32_1 = arith.constant 0 : i32
    return %arg0, %c0_i32, %c0_i32_0 : i32, i32, i32
  }
  func.func @transform_2(%arg0: i32) -> (i32, i32) {
    %c0_i32 = arith.constant 0 : i32
    %c0_i32_0 = arith.constant 0 : i32
    %c0_i32_1 = arith.constant 0 : i32
    return %c0_i32, %c0_i32_0 : i32, i32
  }
  func.func @transform_3(%arg0: i32) -> (i32, i32, i32) {
    %c0_i32 = arith.constant 0 : i32
    %c0_i32_0 = arith.constant 0 : i32
    %c0_i32_1 = arith.constant 0 : i32
    %c0_i32_2 = arith.constant 0 : i32
    return %c0_i32, %c0_i32_0, %c0_i32_1 : i32, i32, i32
  }
  func.func @transform_4(%arg0: i32) -> (i32, i32, i32) {
    %c0_i32 = arith.constant 0 : i32
    %c0_i32_0 = arith.constant 0 : i32
    %c0_i32_1 = arith.constant 0 : i32
    %c0_i32_2 = arith.constant 0 : i32
    return %c0_i32, %c0_i32_0, %c0_i32_1 : i32, i32, i32
  }
  func.func @transform_5(%arg0: i32) -> (i32, i32, i32) {
    %c0_i32 = arith.constant 0 : i32
    %c0_i32_0 = arith.constant 0 : i32
    %c0_i32_1 = arith.constant 0 : i32
    %c0_i32_2 = arith.constant 0 : i32
    return %c0_i32, %c0_i32_0, %c0_i32_1 : i32, i32, i32
  }
  func.func @transform_6(%arg0: i32) -> (i32, i32, i32) {
    %c0_i32 = arith.constant 0 : i32
    %c0_i32_0 = arith.constant 0 : i32
    %c0_i32_1 = arith.constant 0 : i32
    %c0_i32_2 = arith.constant 0 : i32
    return %c0_i32, %c0_i32_0, %c0_i32_1 : i32, i32, i32
  }
  func.func @transform_7(%arg0: i32) -> (i32, i32, i32) {
    %c0_i32 = arith.constant 0 : i32
    %c0_i32_0 = arith.constant 0 : i32
    %c0_i32_1 = arith.constant 0 : i32
    %c0_i32_2 = arith.constant 0 : i32
    return %c0_i32, %c0_i32_0, %c0_i32_1 : i32, i32, i32
  }
  func.func @transform_8(%arg0: i32) -> (i32, i32) {
    %c0_i32 = arith.constant 0 : i32
    %c0_i32_0 = arith.constant 0 : i32
    %c0_i32_1 = arith.constant 0 : i32
    return %c0_i32, %c0_i32_0 : i32, i32
  }
  func.func @transform_9(%arg0: i32) -> (i32, i32, i32) {
    %c0_i32 = arith.constant 0 : i32
    %c0_i32_0 = arith.constant 0 : i32
    %c0_i32_1 = arith.constant 0 : i32
    return %arg0, %c0_i32, %c0_i32_0 : i32, i32, i32
  }
}

</mosaic_0001>

<bundles_post_ra>
// kernel: refine_forward.1
= control target key start
LH: loop header
LB: loop body
LE: loop exit
PB: predicated region body
PF: predicated region fallthrough
CT: control target
= control target key end

     0   :  { %s2940_s30 = smov 0   ;;  %s3772_s0 = inlined_call_operand.vmem [shape: f32[2,4,256], index: 0, kind: input, shape index: {}]   ;;  %s3773_s1 = inlined_call_operand.vmem [shape: f32[2,8,256], index: 1, kind: input, shape index: {}]   ;;  %s3774_s2 = inlined_call_operand.vmem [shape: f32[9,256], index: 2, kind: input, shape index: {}]   ;;  %s3775_s3 = inlined_call_operand.vmem [shape: bf16[9,8,4], index: 3, kind: input, shape index: {}]   ;;  %s3776_s4 = inlined_call_operand.vmem [shape: bf16[9,8,8], index: 4, kind: input, shape index: {}]   ;;  %s3777_s5 = inlined_call_operand.vmem [shape: bf16[9,8,8], index: 5, kind: input, shape index: {}]   ;;  %s3778_s6 = inlined_call_operand.vmem [shape: bf16[9,8,8], index: 6, kind: input, shape index: {}]   ;;  %s3779_s7 = inlined_call_operand.vmem [shape: bf16[9,8,8], index: 7, kind: input, shape index: {}]   ;;  %s3780_s8 = inlined_call_operand.vmem [shape: f32[8,5], index: 8, kind: input, shape index: {}]   ;;  %s3781_s9 = inlined_call_operand.vmem [shape: f32[2,8,256], index: 9, kind: output, shape index: {}]  }
   0x1 LB: > { %s2692_s10 = sadd.s32 4294967295, %s2875_s30   ;;  %p2696_p0 = scmp.ge.s32.totalorder %s2875_s30, 1  ;;  %s2875_s30 = sphi %s2940_s30, %s19_s30  }
   0x2   : > { %p297_p1 = scmp.lt.s32.totalorder %s2875_s30, 3 }
   0x4   : > { %p298_p2 = pnand %p2696_p0, %p297_p1 }
   0x5   : > { %p338_p3 = scmp.lt.s32.totalorder (!%p298_p2), %s2692_s10, 1  ;;  %s2877_s15 = smov (!%p298_p2), 17  }
   0x6   : > { %301 = sbr.rel (%p298_p2) target bundleno = 1670 (0x686), region = 56  ;;  %s2878_s16 = smov (!%p298_p2), 16  }
   0x7   : > { %s2879_s17 = smov (!%p298_p2), 15   ;;  %s2880_s18 = smov (!%p298_p2), 1  }
   0x8   : > { %s2881_s19 = smov (!%p298_p2), 127   ;;  %s2882_s20 = smov (!%p298_p2), 113  }
   0x9   : > { %s2883_s21 = smov (!%p298_p2), 112   ;;  %s2884_s22 = smov (!%p298_p2), 111  }
   0xb   : > { %s3783_s10 = smov (!%p338_p3, %s2692_s10), 1  ;;  %v376_v20 = vlaneseq  ;;  %v2979_v23 = vld [vmem:[%s3774_s2 + $0x8] sm:$0xff]  ;;  %v2984_v24 = vld [vmem:[%s3774_s2] sm:$0xff]  ;;  %vm412_vm2 = vcmask 1041408   ;;  %vm408_vm4 = vcmask 31744   ;;  %vm900_vm10 = vcmask 1043456  }
   0xc   : > { %s2835_s11 = sshll.u32 %s3783_s10, 3  ;;  %v2988_v25 = vperm.slane %v2979_v23, 0  ;;  %v2991_v26 = vperm.slane %v2984_v24, 0  ;;  %v2999_v32 = vperm.slane %v2984_v24, 2  ;;  %v3002_v33 = vperm.slane %v2979_v23, 2  ;;  %s2836_s13 = sshll.u32 %s3783_s10, 4 }
   0xd   : > { %s342_s14 = scalar_lea.vmem %s3772_s0, %s2835_s11  ;;  %v2974_v22 = vand.u32 127, %v376_v20  ;;  %v3016_v44 = vperm.slane %v2984_v24, 1  ;;  %v3019_v45 = vperm.slane %v2979_v23, 1  ;;  %v387_v46 = vld [vmem:[%s3775_s3] sm:$0xf]  ;;  %v3042_v62 = vperm.slane %v2984_v24, 3  ;;  %s347_s24 = scalar_lea.vmem %s3773_s1, %s2836_s13 }
   0xe   : > { %v358_v0 = vld [vmem:[%s342_s14] sm:$0xff]  ;;  %v3045_v63 = vperm.slane %v2979_v23, 3  ;;  %vm896_vm11 = vcmask 64512  }
   0xf   : > { %360 = vst [vmem:[#allocation1] ss:$2 sm:$0xff] %v358_v0  ;;  %vm378_vm0 = vcmp.lt.s32.totalorder %v2974_v22, 17  ;;  %vm489_vm1 = vcmp.lt.s32.totalorder %v2974_v22, 15  ;;  %vm397_vm3 = vcmp.lt.s32.totalorder %v2974_v22, 16  ;;  %vm546_vm5 = vcmp.lt.s32.totalorder %v2974_v22, 1 }
  0x10   : > { %vm642_vm6 = vcmp.lt.s32.totalorder %v2974_v22, 127  ;;  %vm699_vm7 = vcmp.lt.s32.totalorder %v2974_v22, 113  ;;  %vm756_vm8 = vcmp.lt.s32.totalorder %v2974_v22, 112  ;;  %vm813_vm9 = vcmp.lt.s32.totalorder %v2974_v22, 111  ;;  %v2821_v22 = vld [vmem:[%s3779_s7 + $0x14] sm:$0xf] }
  0x16   : > { %v2954_v1 = vld.sshfl [vmem:[#allocation1] sm:$0xff pattern:$0x75316420]  ;;  %v2956_v2 = vld.sshfl [vmem:[#allocation1 + $0x8] sm:$0xff pattern:$0x75316420] }
  0x17   : > { %367 = vst [vmem:[#allocation1] ss:$2 sm:$0xff] %v358_v0  ;;  %v365_v56 = vpack.c.bf16 %v2954_v1, %v2954_v1  ;;  %v366_v57 = vpack.c.bf16 %v2956_v2, %v2956_v2 }
  0x1e   : > { %v368_v3 = vld.sshfl [vmem:[#allocation1] sm:$0xff pattern:$0x75316420]  ;;  %v369_v4 = vld.sshfl [vmem:[#allocation1 + $0x8] sm:$0xff pattern:$0x75316420] }
  0x1f   : > { %372 = vrot.lane.b32.xlu1 %v368_v3, %s2877_s15  ;;  %388 = vst [vmem:[#allocation1] ss:$2 sm:$0xff] %v358_v0  ;;  %v600_v3 = vsel %vm412_vm2, %v365_v56, 0 }
  0x26   : > { %v389_v5 = vld.sshfl [vmem:[#allocation1] sm:$0xff pattern:$0x75316420]  ;;  %v390_v6 = vld.sshfl [vmem:[#allocation1 + $0x8] sm:$0xff pattern:$0x75316420] }
  0x27   : > { %393 = vrot.lane.b32.xlu0 %v389_v5, %s2878_s16  ;;  %374 = vrot.lane.b32.xlu1 %v369_v4, %s2877_s15  ;;  %480 = vst [vmem:[#allocation1] ss:$2 sm:$0xff] %v358_v0  ;;  %v603_v4 = vsel %vm412_vm2, %v366_v57, 0 }
  0x2e   : > { %v481_v7 = vld.sshfl [vmem:[#allocation1] sm:$0xff pattern:$0x75316420]  ;;  %v482_v8 = vld.sshfl [vmem:[#allocation1 + $0x8] sm:$0xff pattern:$0x75316420] }
  0x2f   : > { %395 = vrot.lane.b32.xlu0 %v390_v6, %s2878_s16  ;;  %537 = vst [vmem:[#allocation1] ss:$2 sm:$0xff] %v358_v0  ;;  %485 = vrot.lane.b32.xlu2 %v481_v7, %s2879_s17 }
  0x36   : > { %v539_v9 = vld.sshfl [vmem:[#allocation1 + $0x8] sm:$0xff pattern:$0x75316420]  ;;  %v538_v10 = vld.sshfl [vmem:[#allocation1] sm:$0xff pattern:$0x75316420] }
  0x37   : > { %544 = vrot.lane.b32.xlu1 %v539_v9, %s2880_s18  ;;  %542 = vrot.lane.b32.xlu0 %v538_v10, %s2880_s18  ;;  %633 = vst [vmem:[#allocation1] ss:$2 sm:$0xff] %v358_v0 }
  0x38   : > { %487 = vrot.lane.b32.xlu2 %v482_v8, %s2879_s17 }
  0x3e   : > { %v635_v11 = vld.sshfl [vmem:[#allocation1 + $0x8] sm:$0xff pattern:$0x75316420]  ;;  %v634_v12 = vld.sshfl [vmem:[#allocation1] sm:$0xff pattern:$0x75316420] }
  0x3f   : > { %640 = vrot.lane.b32.xlu0 %v635_v11, %s2881_s19  ;;  %690 = vst [vmem:[#allocation1] ss:$2 sm:$0xff] %v358_v0 }
  0x40   : > { %638 = vrot.lane.b32.xlu2 %v634_v12, %s2881_s19 }
  0x46   : > { %v691_v13 = vld.sshfl [vmem:[#allocation1] sm:$0xff pattern:$0x75316420]  ;;  %v692_v14 = vld.sshfl [vmem:[#allocation1 + $0x8] sm:$0xff pattern:$0x75316420] }
  0x47   : > { %695 = vrot.lane.b32.xlu1 %v691_v13, %s2882_s20  ;;  %747 = vst [vmem:[#allocation1] ss:$2 sm:$0xff] %v358_v0  ;;  %v3064_v13 = vperm.slane %v2984_v24, 5 }
  0x48   : > { %697 = vrot.lane.b32.xlu2 %v692_v14, %s2882_s20  ;;  %v3067_v14 = vperm.slane %v2979_v23, 5 }
  0x4e   : > { %v749_v15 = vld.sshfl [vmem:[#allocation1 + $0x8] sm:$0xff pattern:$0x75316420]  ;;  %v748_v16 = vld.sshfl [vmem:[#allocation1] sm:$0xff pattern:$0x75316420] }
  0x4f   : > { %754 = vrot.lane.b32.xlu1 %v749_v15, %s2883_s21  ;;  %752 = vrot.lane.b32.xlu0 %v748_v16, %s2883_s21  ;;  %804 = vst [vmem:[#allocation1] ss:$2 sm:$0xff] %v358_v0  ;;  %v2703_v0 = vld [vmem:[%s3775_s3 + $0x4] sm:$0xf]  ;;  %v2711_v16 = vld [vmem:[%s3775_s3 + $0xc] sm:$0xf] }
  0x56   : > { %v806_v17 = vld.sshfl [vmem:[#allocation1 + $0x8] sm:$0xff pattern:$0x75316420]  ;;  %v805_v18 = vld.sshfl [vmem:[#allocation1] sm:$0xff pattern:$0x75316420] }
  0x57   : > { %811 = vrot.lane.b32.xlu0 %v806_v17, %s2884_s22  ;;  %809 = vrot.lane.b32.xlu2 %v805_v18, %s2884_s22 }
  0x89   : > { %v486_v19 = vpop.permute.xlu2 %485 }
  0x91   : > { %v373_v21 = vpop.permute.xlu1 %372 }
  0x92   : > { %v488_v27 = vpop.permute.xlu2 %487 }
  0x93   : > { %v490_v36 = vsel %vm489_vm1, %v486_v19, %v488_v27  ;;  %v491_v37 = vsel %vm489_vm1, %v488_v27, %v486_v19 }
  0x94   : > { %v494_v40 = vmul.f32 %v2999_v32, %v491_v37  ;;  %v495_v41 = vmul.f32 %v3002_v33, %v490_v36  ;;  %v2708_v36 = vld [vmem:[%s3775_s3 + $0x8] sm:$0xf] }
  0x96   : > { %v496_v50 = vpack.c.bf16 %v494_v40, %v494_v40  ;;  %v497_v51 = vpack.c.bf16 %v495_v41, %v495_v41 }
  0x98   : > { %v504_v58 = vsel %vm412_vm2, %v496_v50, 0  ;;  %v507_v59 = vsel %vm412_vm2, %v497_v51, 0  ;;  %v2717_v50 = vld [vmem:[%s3775_s3 + $0x14] sm:$0xf] }
  0x99   : > { %v394_v28 = vpop.permute.xlu0 %393  ;;  %v375_v29 = vpop.permute.xlu1 %374 }
  0x9a   : > { %v379_v30 = vsel %vm378_vm0, %v373_v21, %v375_v29  ;;  %v380_v31 = vsel %vm378_vm0, %v375_v29, %v373_v21  ;;  %v639_v15 = vpop.permute.xlu2 %638 }
  0x9b   : > { %v384_v34 = vmul.f32 %v2988_v25, %v379_v30  ;;  %v383_v35 = vmul.f32 %v2991_v26, %v380_v31  ;;  %v3084_v31 = vperm.slane %v2984_v24, 6 }
  0x9d   : > { %v386_v38 = vpack.c.bf16 %v384_v34, %v384_v34  ;;  %v385_v39 = vpack.c.bf16 %v383_v35, %v383_v35  ;;  %v3087_v34 = vperm.slane %v2979_v23, 6 }
  0x9f   : > { %v452_v42 = vsel %vm412_vm2, %v386_v38, 0  ;;  %v449_v43 = vsel %vm412_vm2, %v385_v39, 0 }
  0xa0   : > { %474 = vmatpush.bf16.msra.mxu3 %v452_v42  ;;  %461 = vmatpush.bf16.msra.mxu2 %v449_v43 }
  0xa1   : > { %v396_v47 = vpop.permute.xlu0 %395 }
  0xa2   : > { %v398_v48 = vsel %vm397_vm3, %v394_v28, %v396_v47  ;;  %v399_v49 = vsel %vm397_vm3, %v396_v47, %v394_v28  ;;  %v698_v35 = vpop.permute.xlu2 %697  ;;  %v3105_v47 = vperm.slane %v2979_v23, 7 }
  0xa3   : > { %2707 = vmatmul.msk.bf16.vlgmr.msra.gmra.mxu3 %vm408_vm4, %v387_v46  ;;  %2706 = vmatmul.msk.bf16.vlgmr.msra.gmra.mxu2 %vm408_vm4, %v387_v46  ;;  %v402_v52 = vmul.f32 %v3016_v44, %v399_v49  ;;  %v403_v53 = vmul.f32 %v3019_v45, %v398_v48  ;;  %v3102_v46 = vperm.slane %v2984_v24, 7 }
  0xa5   : > { %v404_v54 = vpack.c.bf16 %v402_v52, %v402_v52  ;;  %v405_v55 = vpack.c.bf16 %v403_v53, %v403_v53 }
  0xa7   : > { %v414_v60 = vsel %vm412_vm2, %v404_v54, 0  ;;  %v417_v61 = vsel %vm412_vm2, %v405_v55, 0 }
  0xa8   : > { %426 = vmatpush.bf16.msra.mxu0 %v414_v60  ;;  %439 = vmatpush.bf16.msra.mxu1 %v417_v61  ;;  %v3131_v60 = vld [vmem:[%s3774_s2 + $0x18] ss:$0 sm:$0xff] }
  0xa9   : > { %v545_v1 = vpop.permute.xlu1 %544  ;;  %v543_v2 = vpop.permute.xlu0 %542 }
  0xaa   : > { %v547_v5 = vsel %vm546_vm5, %v543_v2, %v545_v1  ;;  %v548_v6 = vsel %vm546_vm5, %v545_v1, %v543_v2 }
  0xab   : > { %2704 = vmatmul.msk.bf16.vlgmr.msra.gmra.mxu0 %vm408_vm4, %v2703_v0  ;;  %2705 = vmatmul.msk.bf16.vlgmr.msra.gmra.mxu1 %vm408_vm4, %v2703_v0  ;;  %v551_v7 = vmul.f32 %v3042_v62, %v548_v6  ;;  %v552_v8 = vmul.f32 %v3045_v63, %v547_v5  ;;  %v2714_v0 = vld [vmem:[%s3775_s3 + $0x10] sm:$0xf]  ;;  %v3147_v6 = vld [vmem:[%s3780_s8] sm:$0xff] }
  0xac   : > { %516 = vmatpush.bf16.msrb.mxu0 %v504_v58  ;;  %529 = vmatpush.bf16.msrb.mxu1 %v507_v59  ;;  %v3126_v59 = vld [vmem:[%s3774_s2 + $0x10] ss:$0 sm:$0xff] }
  0xad   : > { %v553_v9 = vpack.c.bf16 %v551_v7, %v551_v7  ;;  %v554_v10 = vpack.c.bf16 %v552_v8, %v552_v8  ;;  %v2885_v7 = vmov 0  }
  0xae   : > { %2859 = vset.pattern.permute.xlu1 %v2885_v7 }
  0xaf   : > { %v561_v11 = vsel %vm412_vm2, %v553_v9, 0  ;;  %v564_v12 = vsel %vm412_vm2, %v554_v10, 0  ;;  %864 = vperm.xlu1 %2859, %v3147_v6  }
  0xb0   : > { %612 = vmatpush.bf16.msra.mxu0 %v600_v3  ;;  %625 = vmatpush.bf16.msra.mxu1 %v603_v4 }
  0xb1   : > { %573 = vmatpush.bf16.msrb.mxu2 %v561_v11  ;;  %586 = vmatpush.bf16.msrb.mxu3 %v564_v12  ;;  %v641_v17 = vpop.permute.xlu0 %640  ;;  %v810_v61 = vpop.permute.xlu2 %809  ;;  %v2723_v12 = vld [vmem:[%s3775_s3 + $0x1c] sm:$0xf] }
  0xb2   : > { %v643_v18 = vsel %vm642_vm6, %v639_v15, %v641_v17  ;;  %v644_v19 = vsel %vm642_vm6, %v641_v17, %v639_v15  ;;  %v2720_v15 = vld [vmem:[%s3775_s3 + $0x18] sm:$0xf] }
  0xb3   : > { %v647_v20 = vmul.f32 %v3064_v13, %v643_v18  ;;  %v648_v21 = vmul.f32 %v3067_v14, %v644_v19 }
  0xb4   : > { %2712 = vmatmul.msk.bf16.vlgmr.msrb.gmra.mxu2 %vm408_vm4, %v2711_v16  ;;  %2713 = vmatmul.msk.bf16.vlgmr.msrb.gmra.mxu3 %vm408_vm4, %v2711_v16  ;;  %v2726_v16 = vld [vmem:[%s3775_s3 + $0x20] sm:$0xf] }
  0xb5   : > { %v649_v27 = vpack.c.bf16 %v647_v20, %v647_v20  ;;  %v650_v28 = vpack.c.bf16 %v648_v21, %v648_v21 }
  0xb7   : > { %v657_v29 = vsel %vm412_vm2, %v649_v27, 0  ;;  %v660_v30 = vsel %vm412_vm2, %v650_v28, 0 }
  0xb8   : > { %669 = vmatpush.bf16.msra.mxu2 %v657_v29  ;;  %682 = vmatpush.bf16.msra.mxu3 %v660_v30 }
  0xb9   : > { %v696_v37 = vpop.permute.xlu1 %695 }
  0xba   : > { %v700_v38 = vsel %vm699_vm7, %v696_v37, %v698_v35  ;;  %v701_v39 = vsel %vm699_vm7, %v698_v35, %v696_v37 }
  0xbb   : > { %2709 = vmatmul.msk.bf16.vlgmr.msrb.gmra.mxu0 %vm408_vm4, %v2708_v36  ;;  %2710 = vmatmul.msk.bf16.vlgmr.msrb.gmra.mxu1 %vm408_vm4, %v2708_v36  ;;  %v704_v40 = vmul.f32 %v3084_v31, %v700_v38  ;;  %v705_v41 = vmul.f32 %v3087_v34, %v701_v39 }
  0xbd   : > { %v706_v42 = vpack.c.bf16 %v704_v40, %v704_v40  ;;  %v707_v43 = vpack.c.bf16 %v705_v41, %v705_v41 }
  0xbf   : > { %v714_v48 = vsel %vm412_vm2, %v706_v42, 0  ;;  %v717_v49 = vsel %vm412_vm2, %v707_v43, 0 }
  0xc0   : > { %726 = vmatpush.bf16.msrb.mxu0 %v714_v48  ;;  %739 = vmatpush.bf16.msrb.mxu1 %v717_v49 }
  0xc1   : > { %v755_v51 = vpop.permute.xlu1 %754  ;;  %v753_v52 = vpop.permute.xlu0 %752 }
  0xc2   : > { %v757_v53 = vsel %vm756_vm8, %v753_v52, %v755_v51  ;;  %v758_v24 = vsel %vm756_vm8, %v755_v51, %v753_v52 }
  0xc3   : > { %v761_v23 = vmul.f32 %v3102_v46, %v757_v53  ;;  %v762_v54 = vmul.f32 %v3105_v47, %v758_v24 }
  0xc4   : > { %2718 = vmatmul.msk.bf16.vlgmr.msra.gmra.mxu2 %vm408_vm4, %v2717_v50  ;;  %2719 = vmatmul.msk.bf16.vlgmr.msra.gmra.mxu3 %vm408_vm4, %v2717_v50 }
  0xc5   : > { %v763_v55 = vpack.c.bf16 %v761_v23, %v761_v23  ;;  %v764_v56 = vpack.c.bf16 %v762_v54, %v762_v54 }
  0xc7   : > { %v771_v57 = vsel %vm412_vm2, %v763_v55, 0  ;;  %v774_v58 = vsel %vm412_vm2, %v764_v56, 0 }
  0xc8   : > { %783 = vmatpush.bf16.msrb.mxu2 %v771_v57  ;;  %796 = vmatpush.bf16.msrb.mxu3 %v774_v58 }
  0xc9   : > { %v812_v1 = vpop.permute.xlu0 %811 }
  0xca   : > { %v814_v2 = vsel %vm813_vm9, %v810_v61, %v812_v1  ;;  %v815_v3 = vsel %vm813_vm9, %v812_v1, %v810_v61 }
  0xcb   : > { %2715 = vmatmul.msk.bf16.vlgmr.msra.gmra.mxu0 %vm408_vm4, %v2714_v0  ;;  %2716 = vmatmul.msk.bf16.vlgmr.msra.gmra.mxu1 %vm408_vm4, %v2714_v0  ;;  %v818_v4 = vmul.f32 %v3126_v59, %v814_v2  ;;  %v819_v5 = vmul.f32 %v3131_v60, %v815_v3 }
  0xcd   : > { %v820_v8 = vpack.c.bf16 %v818_v4, %v818_v4  ;;  %v821_v9 = vpack.c.bf16 %v819_v5, %v819_v5 }
  0xcf   : > { %v828_v10 = vsel %vm412_vm2, %v820_v8, 0  ;;  %v831_v11 = vsel %vm412_vm2, %v821_v9, 0 }
  0xd0   : > { %840 = vmatpush.bf16.msra.mxu0 %v828_v10  ;;  %853 = vmatpush.bf16.msra.mxu1 %v831_v11 }
  0xd4   : > { %2724 = vmatmul.msk.bf16.vlgmr.msrb.gmra.mxu2 %vm408_vm4, %v2723_v12  ;;  %2725 = vmatmul.msk.bf16.vlgmr.msrb.gmra.mxu3 %vm408_vm4, %v2723_v12 }
  0xdb   : > { %2721 = vmatmul.msk.bf16.vlgmr.msrb.gmra.mxu0 %vm408_vm4, %v2720_v15  ;;  %2722 = vmatmul.msk.bf16.vlgmr.msrb.gmra.mxu1 %vm408_vm4, %v2720_v15 }
  0xeb   : > { %2727 = vmatmul.msk.bf16.vlgmr.msra.gmra.mxu0 %vm408_vm4, %v2726_v16  ;;  %2728 = vmatmul.msk.bf16.vlgmr.msra.gmra.mxu1 %vm408_vm4, %v2726_v16 }
 0x126   : > { %v476_v17 = vpop.f32.mrf.mxu3  ;;  %v463_v18 = vpop.f32.mrf.mxu2 }
 0x128   : > { %v428_v19 = vpop.f32.mrf.mxu0  ;;  %v441_v20 = vpop.f32.mrf.mxu1 }
 0x129   : > { %v477_v24 = vadd.f32 %v476_v17, %v441_v20  ;;  %v464_v23 = vadd.f32 %v463_v18, %v428_v19  ;;  %v865_v17 = vpop.permute.xlu1 %864 }
 0x12e   : > { %v465_v21 = vpop.f32.mrf.mxu2  ;;  %v478_v27 = vpop.f32.mrf.mxu3 }
 0x130   : > { %v430_v28 = vpop.f32.mrf.mxu0  ;;  %v443_v29 = vpop.f32.mrf.mxu1 }
 0x137   : > { %v575_v30 = vpop.f32.mrf.mxu2  ;;  %v588_v35 = vpop.f32.mrf.mxu3 }
 0x138   : > { %v518_v36 = vpop.f32.mrf.mxu0  ;;  %v531_v37 = vpop.f32.mrf.mxu1 }
 0x139   : > { %v535_v56 = vadd.f32 %v518_v36, %v464_v23  ;;  %v536_v57 = vadd.f32 %v531_v37, %v477_v24 }
 0x13b   : > { %v592_v0 = vadd.f32 %v575_v30, %v535_v56  ;;  %v593_v1 = vadd.f32 %v588_v35, %v536_v57 }
 0x13f   : > { %v577_v38 = vpop.f32.mrf.mxu2  ;;  %v590_v39 = vpop.f32.mrf.mxu3 }
 0x140   : > { %v520_v40 = vpop.f32.mrf.mxu0  ;;  %v533_v41 = vpop.f32.mrf.mxu1 }
 0x147   : > { %v671_v42 = vpop.f32.mrf.mxu2  ;;  %v684_v43 = vpop.f32.mrf.mxu3 }
 0x148   : > { %v614_v48 = vpop.f32.mrf.mxu0  ;;  %v627_v49 = vpop.f32.mrf.mxu1 }
 0x149   : > { %v631_v2 = vadd.f32 %v614_v48, %v592_v0  ;;  %v632_v3 = vadd.f32 %v627_v49, %v593_v1 }
 0x14b   : > { %v688_v9 = vadd.f32 %v671_v42, %v631_v2  ;;  %v689_v10 = vadd.f32 %v684_v43, %v632_v3  ;;  %v2729_v2 = vld [vmem:[%s3776_s4 + $0x4] sm:$0xf] }
 0x14f   : > { %v673_v50 = vpop.f32.mrf.mxu2  ;;  %v686_v51 = vpop.f32.mrf.mxu3 }
 0x150   : > { %v616_v52 = vpop.f32.mrf.mxu0  ;;  %v629_v53 = vpop.f32.mrf.mxu1 }
 0x157   : > { %v785_v54 = vpop.f32.mrf.mxu2  ;;  %v798_v55 = vpop.f32.mrf.mxu3 }
 0x158   : > { %v728_v58 = vpop.f32.mrf.mxu0  ;;  %v741_v61 = vpop.f32.mrf.mxu1 }
 0x159   : > { %v745_v11 = vadd.f32 %v728_v58, %v688_v9  ;;  %v746_v12 = vadd.f32 %v741_v61, %v689_v10 }
 0x15b   : > { %v802_v15 = vadd.f32 %v785_v54, %v745_v11  ;;  %v803_v16 = vadd.f32 %v798_v55, %v746_v12 }
 0x15f   : > { %v800_v4 = vpop.f32.mrf.mxu3  ;;  %v787_v5 = vpop.f32.mrf.mxu2 }
 0x160   : > { %v730_v7 = vpop.f32.mrf.mxu0  ;;  %v743_v8 = vpop.f32.mrf.mxu1 }
 0x168   : > { %v842_v18 = vpop.f32.mrf.mxu0  ;;  %v855_v19 = vpop.f32.mrf.mxu1 }
 0x169   : > { %v859_v20 = vadd.f32 %v842_v18, %v802_v15  ;;  %v860_v21 = vadd.f32 %v855_v19, %v803_v16  ;;  %v883_v19 = vld [vmem:[%s3776_s4] sm:$0xf] }
 0x16b   : > { %v3167_v27 = vadd.f32 %v865_v17, %v859_v20  ;;  %v3169_v28 = vadd.f32 %v865_v17, %v860_v21 }
 0x16d   : > { %v869_v29 = vmax.f32 %v3167_v27, 0.0  ;;  %v870_v30 = vmax.f32 %v3169_v28, 0.0 }
 0x16f   : > { %886 = vrot.lane.b32.xlu0 %v870_v30, %s2878_s16  ;;  %968 = vrot.lane.b32.xlu1 %v869_v29, %s2879_s17  ;;  %v871_v56 = vpack.c.bf16 %v869_v29, %v869_v29  ;;  %v872_v57 = vpack.c.bf16 %v870_v30, %v870_v30 }
 0x170   : > { %884 = vrot.lane.b32.xlu2 %v869_v29, %s2878_s16  ;;  %v857_v35 = vpop.f32.mrf.mxu1  ;;  %v844_v36 = vpop.f32.mrf.mxu0 }
 0x171   : > { %v1072_v10 = vsel %vm900_vm10, %v871_v56, 0  ;;  %v1075_v11 = vsel %vm900_vm10, %v872_v57, 0 }
 0x177   : > { %873 = vrot.lane.b32.xlu0 %v869_v29, %s2877_s15  ;;  %875 = vrot.lane.b32.xlu1 %v870_v30, %s2877_s15 }
 0x178   : > { %970 = vrot.lane.b32.xlu2 %v870_v30, %s2879_s17 }
 0x17f   : > { %1019 = vrot.lane.b32.xlu0 %v870_v30, %s2880_s18  ;;  %1154 = vrot.lane.b32.xlu1 %v869_v29, %s2882_s20 }
 0x180   : > { %1017 = vrot.lane.b32.xlu2 %v869_v29, %s2880_s18 }
 0x187   : > { %1105 = vrot.lane.b32.xlu0 %v869_v29, %s2881_s19  ;;  %1107 = vrot.lane.b32.xlu1 %v870_v30, %s2881_s19 }
 0x188   : > { %1156 = vrot.lane.b32.xlu2 %v870_v30, %s2882_s20 }
 0x18f   : > { %1254 = vrot.lane.b32.xlu0 %v870_v30, %s2884_s22  ;;  %1203 = vrot.lane.b32.xlu1 %v869_v29, %s2883_s21 }
 0x190   : > { %1252 = vrot.lane.b32.xlu2 %v869_v29, %s2884_s22 }
 0x198   : > { %1205 = vrot.lane.b32.xlu2 %v870_v30, %s2883_s21 }
 0x1ca   : > { %v885_v37 = vpop.permute.xlu2 %884 }
 0x1d2   : > { %v971_v38 = vpop.permute.xlu2 %970 }
 0x1da   : > { %v1018_v41 = vpop.permute.xlu2 %1017 }
 0x1e1   : > { %v887_v39 = vpop.permute.xlu0 %886  ;;  %v969_v40 = vpop.permute.xlu1 %968 }
 0x1e2   : > { %v888_v42 = vsel %vm397_vm3, %v885_v37, %v887_v39  ;;  %v889_v43 = vsel %vm397_vm3, %v887_v39, %v885_v37  ;;  %v972_v48 = vsel %vm489_vm1, %v969_v40, %v971_v38  ;;  %v973_v49 = vsel %vm489_vm1, %v971_v38, %v969_v40  ;;  %v1157_v12 = vpop.permute.xlu2 %1156 }
 0x1e3   : > { %v890_v50 = vmul.f32 %v889_v43, %v3016_v44  ;;  %v891_v51 = vmul.f32 %v888_v42, %v3019_v45  ;;  %v974_v52 = vmul.f32 %v973_v49, %v2999_v32  ;;  %v975_v53 = vmul.f32 %v972_v48, %v3002_v33 }
 0x1e5   : > { %v892_v24 = vpack.c.bf16 %v890_v50, %v890_v50  ;;  %v893_v23 = vpack.c.bf16 %v891_v51, %v891_v51  ;;  %v976_v54 = vpack.c.bf16 %v974_v52, %v974_v52  ;;  %v977_v55 = vpack.c.bf16 %v975_v53, %v975_v53  ;;  %v2734_v52 = vld [vmem:[%s3776_s4 + $0x8] sm:$0xf] }
 0x1e7   : > { %v902_v58 = vsel %vm900_vm10, %v892_v24, 0  ;;  %v905_v61 = vsel %vm900_vm10, %v893_v23, 0  ;;  %v984_v0 = vsel %vm900_vm10, %v976_v54, 0  ;;  %v987_v1 = vsel %vm900_vm10, %v977_v55, 0 }
 0x1e8   : > { %914 = vmatpush.bf16.msra.mxu2 %v902_v58  ;;  %927 = vmatpush.bf16.msra.mxu3 %v905_v61 }
 0x1e9   : > { %v874_v3 = vpop.permute.xlu0 %873  ;;  %v876_v4 = vpop.permute.xlu1 %875 }
 0x1ea   : > { %v877_v5 = vsel %vm378_vm0, %v874_v3, %v876_v4  ;;  %v878_v7 = vsel %vm378_vm0, %v876_v4, %v874_v3  ;;  %v1253_v43 = vpop.permute.xlu2 %1252  ;;  %v2737_v4 = vld [vmem:[%s3776_s4 + $0xc] sm:$0xf] }
 0x1eb   : > { %v879_v8 = vmul.f32 %v878_v7, %v2991_v26  ;;  %v880_v9 = vmul.f32 %v877_v5, %v2988_v25  ;;  %2730 = vmatmul.msk.bf16.vlgmr.msra.gmra.mxu2 %vm896_vm11, %v2729_v2  ;;  %2731 = vmatmul.msk.bf16.vlgmr.msra.gmra.mxu3 %vm896_vm11, %v2729_v2 }
 0x1ec   : > { %996 = vmatpush.bf16.msrb.mxu2 %v984_v0  ;;  %1009 = vmatpush.bf16.msrb.mxu3 %v987_v1 }
 0x1ed   : > { %v881_v15 = vpack.c.bf16 %v879_v8, %v879_v8  ;;  %v882_v16 = vpack.c.bf16 %v880_v9, %v880_v9 }
 0x1ef   : > { %v937_v17 = vsel %vm900_vm10, %v881_v15, 0  ;;  %v940_v18 = vsel %vm900_vm10, %v882_v16, 0 }
 0x1f0   : > { %1084 = vmatpush.bf16.msra.mxu2 %v1072_v10  ;;  %1097 = vmatpush.bf16.msra.mxu3 %v1075_v11 }
 0x1f1   : > { %949 = vmatpush.bf16.msrb.mxu0 %v937_v17  ;;  %962 = vmatpush.bf16.msrb.mxu1 %v940_v18  ;;  %v1020_v20 = vpop.permute.xlu0 %1019  ;;  %v1155_v21 = vpop.permute.xlu1 %1154 }
 0x1f2   : > { %v1021_v29 = vsel %vm546_vm5, %v1018_v41, %v1020_v20  ;;  %v1022_v30 = vsel %vm546_vm5, %v1020_v20, %v1018_v41  ;;  %v1158_v35 = vsel %vm699_vm7, %v1155_v21, %v1157_v12  ;;  %v1159_v36 = vsel %vm699_vm7, %v1157_v12, %v1155_v21  ;;  %v1206_v3 = vpop.permute.xlu2 %1205 }
 0x1f3   : > { %v1023_v37 = vmul.f32 %v1022_v30, %v3042_v62  ;;  %v1024_v38 = vmul.f32 %v1021_v29, %v3045_v63  ;;  %v1160_v39 = vmul.f32 %v1158_v35, %v3084_v31  ;;  %v1161_v40 = vmul.f32 %v1159_v36, %v3087_v34  ;;  %v2740_v35 = vld [vmem:[%s3776_s4 + $0x10] sm:$0xf] }
 0x1f4   : > { %2732 = vmatmul.msk.bf16.vlgmr.msrb.gmra.mxu0 %vm896_vm11, %v883_v19  ;;  %2733 = vmatmul.msk.bf16.vlgmr.msrb.gmra.mxu1 %vm896_vm11, %v883_v19 }
 0x1f5   : > { %v1025_v42 = vpack.c.bf16 %v1023_v37, %v1023_v37  ;;  %v1026_v41 = vpack.c.bf16 %v1024_v38, %v1024_v38  ;;  %v1162_v48 = vpack.c.bf16 %v1160_v39, %v1160_v39  ;;  %v1163_v49 = vpack.c.bf16 %v1161_v40, %v1161_v40  ;;  %v2743_v39 = vld [vmem:[%s3776_s4 + $0x14] sm:$0xf]  ;;  %v2746_v40 = vld [vmem:[%s3776_s4 + $0x18] sm:$0xf] }
 0x1f6   : > { %v2886_v38 = vmov 1  }
 0x1f7   : > { %v1033_v50 = vsel %vm900_vm10, %v1025_v42, 0  ;;  %v1036_v51 = vsel %vm900_vm10, %v1026_v41, 0  ;;  %v1170_v57 = vsel %vm900_vm10, %v1162_v48, 0  ;;  %v1173_v58 = vsel %vm900_vm10, %v1163_v49, 0  ;;  %2860 = vset.pattern.permute.xlu0 %v2886_v38  ;;  %v2749_v42 = vld [vmem:[%s3776_s4 + $0x1c] sm:$0xf] }
 0x1f8   : > { %1045 = vmatpush.bf16.msra.mxu0 %v1033_v50  ;;  %1058 = vmatpush.bf16.msra.mxu1 %v1036_v51  ;;  %v2752_v41 = vld [vmem:[%s3776_s4 + $0x20] sm:$0xf] }
 0x1f9   : > { %v1106_v53 = vpop.permute.xlu0 %1105  ;;  %v1108_v24 = vpop.permute.xlu1 %1107  ;;  %1302 = vperm.xlu0 %2860, %v3147_v6  }
 0x1fa   : > { %v1109_v23 = vsel %vm642_vm6, %v1106_v53, %v1108_v24  ;;  %v1110_v54 = vsel %vm642_vm6, %v1108_v24, %v1106_v53 }
 0x1fb   : > { %v1111_v55 = vmul.f32 %v1109_v23, %v3064_v13  ;;  %v1112_v56 = vmul.f32 %v1110_v54, %v3067_v14  ;;  %2735 = vmatmul.msk.bf16.vlgmr.msrb.gmra.mxu2 %vm896_vm11, %v2734_v52  ;;  %2736 = vmatmul.msk.bf16.vlgmr.msrb.gmra.mxu3 %vm896_vm11, %v2734_v52 }
 0x1fc   : > { %1182 = vmatpush.bf16.msrb.mxu2 %v1170_v57  ;;  %1195 = vmatpush.bf16.msrb.mxu3 %v1173_v58 }
 0x1fd   : > { %v1113_v61 = vpack.c.bf16 %v1111_v55, %v1111_v55  ;;  %v1114_v0 = vpack.c.bf16 %v1112_v56, %v1112_v56 }
 0x1ff   : > { %v1121_v1 = vsel %vm900_vm10, %v1113_v61, 0  ;;  %v1124_v2 = vsel %vm900_vm10, %v1114_v0, 0 }
 0x200   : > { %1133 = vmatpush.bf16.msrb.mxu0 %v1121_v1  ;;  %1146 = vmatpush.bf16.msrb.mxu1 %v1124_v2 }
 0x201   : > { %v1255_v5 = vpop.permute.xlu0 %1254  ;;  %v1204_v7 = vpop.permute.xlu1 %1203 }
 0x202   : > { %v1256_v8 = vsel %vm813_vm9, %v1253_v43, %v1255_v5  ;;  %v1257_v9 = vsel %vm813_vm9, %v1255_v5, %v1253_v43  ;;  %v1207_v10 = vsel %vm756_vm8, %v1204_v7, %v1206_v3  ;;  %v1208_v11 = vsel %vm756_vm8, %v1206_v3, %v1204_v7 }
 0x203   : > { %v1258_v12 = vmul.f32 %v3126_v59, %v1256_v8  ;;  %v1259_v15 = vmul.f32 %v3131_v60, %v1257_v9  ;;  %v1209_v16 = vmul.f32 %v1207_v10, %v3102_v46  ;;  %v1210_v17 = vmul.f32 %v1208_v11, %v3105_v47 }
 0x204   : > { %2738 = vmatmul.msk.bf16.vlgmr.msra.gmra.mxu0 %vm896_vm11, %v2737_v4  ;;  %2739 = vmatmul.msk.bf16.vlgmr.msra.gmra.mxu1 %vm896_vm11, %v2737_v4 }
 0x205   : > { %v1211_v18 = vpack.c.bf16 %v1209_v16, %v1209_v16  ;;  %v1212_v19 = vpack.c.bf16 %v1210_v17, %v1210_v17  ;;  %v1260_v20 = vpack.c.bf16 %v1258_v12, %v1258_v12  ;;  %v1261_v21 = vpack.c.bf16 %v1259_v15, %v1259_v15 }
 0x207   : > { %v1219_v29 = vsel %vm900_vm10, %v1211_v18, 0  ;;  %v1222_v30 = vsel %vm900_vm10, %v1212_v19, 0  ;;  %v1268_v36 = vsel %vm900_vm10, %v1260_v20, 0  ;;  %v1271_v37 = vsel %vm900_vm10, %v1261_v21, 0 }
 0x208   : > { %1231 = vmatpush.bf16.msra.mxu0 %v1219_v29  ;;  %1244 = vmatpush.bf16.msra.mxu1 %v1222_v30 }
 0x20b   : > { %2741 = vmatmul.msk.bf16.vlgmr.msra.gmra.mxu2 %vm896_vm11, %v2740_v35  ;;  %2742 = vmatmul.msk.bf16.vlgmr.msra.gmra.mxu3 %vm896_vm11, %v2740_v35 }
 0x20c   : > { %1280 = vmatpush.bf16.msra.mxu2 %v1268_v36  ;;  %1293 = vmatpush.bf16.msra.mxu3 %v1271_v37 }
 0x214   : > { %2744 = vmatmul.msk.bf16.vlgmr.msrb.gmra.mxu0 %vm896_vm11, %v2743_v39  ;;  %2745 = vmatmul.msk.bf16.vlgmr.msrb.gmra.mxu1 %vm896_vm11, %v2743_v39 }
 0x21b   : > { %2747 = vmatmul.msk.bf16.vlgmr.msrb.gmra.mxu2 %vm896_vm11, %v2746_v40  ;;  %2748 = vmatmul.msk.bf16.vlgmr.msrb.gmra.mxu3 %vm896_vm11, %v2746_v40 }
 0x224   : > { %2750 = vmatmul.msk.bf16.vlgmr.msra.gmra.mxu0 %vm896_vm11, %v2749_v42  ;;  %2751 = vmatmul.msk.bf16.vlgmr.msra.gmra.mxu1 %vm896_vm11, %v2749_v42 }
 0x22b   : > { %2753 = vmatmul.msk.bf16.vlgmr.msra.gmra.mxu2 %vm896_vm11, %v2752_v41  ;;  %2754 = vmatmul.msk.bf16.vlgmr.msra.gmra.mxu3 %vm896_vm11, %v2752_v41 }
 0x26e   : > { %v916_v43 = vpop.f32.mrf.mxu2  ;;  %v929_v48 = vpop.f32.mrf.mxu3 }
 0x271   : > { %v951_v49 = vpop.f32.mrf.mxu0  ;;  %v964_v50 = vpop.f32.mrf.mxu1 }
 0x272   : > { %v965_v9 = vadd.f32 %v964_v50, %v929_v48  ;;  %v952_v11 = vadd.f32 %v951_v49, %v916_v43  ;;  %v1303_v49 = vpop.permute.xlu0 %1302 }
 0x276   : > { %v918_v51 = vpop.f32.mrf.mxu2  ;;  %v931_v52 = vpop.f32.mrf.mxu3 }
 0x279   : > { %v953_v53 = vpop.f32.mrf.mxu0  ;;  %v966_v24 = vpop.f32.mrf.mxu1 }
 0x27e   : > { %v998_v23 = vpop.f32.mrf.mxu2  ;;  %v1011_v54 = vpop.f32.mrf.mxu3 }
 0x27f   : > { %v1015_v12 = vadd.f32 %v998_v23, %v952_v11  ;;  %v1016_v15 = vadd.f32 %v1011_v54, %v965_v9 }
 0x281   : > { %v1047_v55 = vpop.f32.mrf.mxu0  ;;  %v1060_v56 = vpop.f32.mrf.mxu1 }
 0x282   : > { %v1064_v19 = vadd.f32 %v1047_v55, %v1015_v12  ;;  %v1065_v20 = vadd.f32 %v1060_v56, %v1016_v15  ;;  %v2755_v15 = vld [vmem:[%s3777_s5 + $0x4] sm:$0xf] }
 0x286   : > { %v1000_v57 = vpop.f32.mrf.mxu2  ;;  %v1013_v58 = vpop.f32.mrf.mxu3 }
 0x289   : > { %v1049_v61 = vpop.f32.mrf.mxu0  ;;  %v1062_v0 = vpop.f32.mrf.mxu1 }
 0x28e   : > { %v1086_v1 = vpop.f32.mrf.mxu2  ;;  %v1099_v2 = vpop.f32.mrf.mxu3 }
 0x28f   : > { %v1103_v29 = vadd.f32 %v1086_v1, %v1064_v19  ;;  %v1104_v30 = vadd.f32 %v1099_v2, %v1065_v20 }
 0x291   : > { %v1135_v3 = vpop.f32.mrf.mxu0  ;;  %v1148_v4 = vpop.f32.mrf.mxu1 }
 0x292   : > { %v1152_v37 = vadd.f32 %v1135_v3, %v1103_v29  ;;  %v1153_v38 = vadd.f32 %v1148_v4, %v1104_v30 }
 0x296   : > { %v1088_v5 = vpop.f32.mrf.mxu2  ;;  %v1101_v7 = vpop.f32.mrf.mxu3 }
 0x299   : > { %v1137_v8 = vpop.f32.mrf.mxu0  ;;  %v1150_v10 = vpop.f32.mrf.mxu1 }
 0x29e   : > { %v1184_v16 = vpop.f32.mrf.mxu2  ;;  %v1197_v17 = vpop.f32.mrf.mxu3 }
 0x29f   : > { %v1201_v40 = vadd.f32 %v1184_v16, %v1152_v37  ;;  %v1202_v42 = vadd.f32 %v1197_v17, %v1153_v38 }
 0x2a1   : > { %v1233_v18 = vpop.f32.mrf.mxu0  ;;  %v1246_v21 = vpop.f32.mrf.mxu1 }
 0x2a2   : > { %v1250_v48 = vadd.f32 %v1233_v18, %v1201_v40  ;;  %v1251_v43 = vadd.f32 %v1246_v21, %v1202_v42 }
 0x2a6   : > { %v1186_v35 = vpop.f32.mrf.mxu2  ;;  %v1199_v36 = vpop.f32.mrf.mxu3 }
 0x2a9   : > { %v1235_v39 = vpop.f32.mrf.mxu0  ;;  %v1248_v41 = vpop.f32.mrf.mxu1 }
 0x2ae   : > { %v1282_v50 = vpop.f32.mrf.mxu2  ;;  %v1295_v51 = vpop.f32.mrf.mxu3 }
 0x2af   : > { %v1299_v52 = vadd.f32 %v1282_v50, %v1250_v48  ;;  %v1300_v53 = vadd.f32 %v1295_v51, %v1251_v43  ;;  %v1321_v50 = vld [vmem:[%s3777_s5] sm:$0xf] }
 0x2b1   : > { %v1305_v24 = vadd.f32 %v1303_v49, %v1299_v52  ;;  %v1306_v23 = vadd.f32 %v1303_v49, %v1300_v53 }
 0x2b3   : > { %v3301_v54 = vmax.f32 %v1305_v24, 0.0  ;;  %v3303_v55 = vmax.f32 %v1306_v23, 0.0 }
 0x2b5   : > { %1324 = vrot.lane.b32.xlu2 %v3303_v55, %s2878_s16  ;;  %1404 = vrot.lane.b32.xlu0 %v3301_v54, %s2879_s17 }
 0x2b6   : > { %1322 = vrot.lane.b32.xlu1 %v3301_v54, %s2878_s16  ;;  %v1284_v56 = vpop.f32.mrf.mxu2  ;;  %v1297_v57 = vpop.f32.mrf.mxu3 }
 0x2b7   : > { %v1310_v56 = vpack.c.bf16 %v3303_v55, %v3303_v55  ;;  %v1309_v57 = vpack.c.bf16 %v3301_v54, %v3301_v54 }
 0x2bd   : > { %1313 = vrot.lane.b32.xlu2 %v3303_v55, %s2877_s15  ;;  %1455 = vrot.lane.b32.xlu0 %v3303_v55, %s2880_s18 }
 0x2be   : > { %1311 = vrot.lane.b32.xlu1 %v3301_v54, %s2877_s15 }
 0x2c5   : > { %1453 = vrot.lane.b32.xlu2 %v3301_v54, %s2880_s18  ;;  %1590 = vrot.lane.b32.xlu0 %v3301_v54, %s2882_s20 }
 0x2c6   : > { %1406 = vrot.lane.b32.xlu1 %v3303_v55, %s2879_s17 }
 0x2cd   : > { %1543 = vrot.lane.b32.xlu2 %v3303_v55, %s2881_s19  ;;  %1641 = vrot.lane.b32.xlu0 %v3303_v55, %s2883_s21 }
 0x2ce   : > { %1541 = vrot.lane.b32.xlu1 %v3301_v54, %s2881_s19 }
 0x2d5   : > { %1639 = vrot.lane.b32.xlu2 %v3301_v54, %s2883_s21 }
 0x2d6   : > { %1592 = vrot.lane.b32.xlu1 %v3303_v55, %s2882_s20 }
 0x2dd   : > { %1690 = vrot.lane.b32.xlu2 %v3303_v55, %s2884_s22  ;;  %v2760_v55 = vld [vmem:[%s3777_s5 + $0x8] sm:$0xf] }
 0x2de   : > { %1688 = vrot.lane.b32.xlu1 %v3301_v54, %s2884_s22 }
 0x30f   : > { %v1325_v58 = vpop.permute.xlu2 %1324 }
 0x317   : > { %v1314_v61 = vpop.permute.xlu2 %1313 }
 0x31f   : > { %v1454_v7 = vpop.permute.xlu2 %1453 }
 0x327   : > { %v1405_v0 = vpop.permute.xlu0 %1404  ;;  %v1544_v40 = vpop.permute.xlu2 %1543 }
 0x328   : > { %v1323_v1 = vpop.permute.xlu1 %1322 }
 0x329   : > { %v1326_v2 = vsel %vm397_vm3, %v1323_v1, %v1325_v58  ;;  %v1327_v3 = vsel %vm397_vm3, %v1325_v58, %v1323_v1 }
 0x32a   : > { %v1328_v4 = vmul.f32 %v1327_v3, %v3016_v44  ;;  %v1329_v5 = vmul.f32 %v1326_v2, %v3019_v45 }
 0x32c   : > { %v1330_v8 = vpack.c.bf16 %v1328_v4, %v1328_v4  ;;  %v1331_v9 = vpack.c.bf16 %v1329_v5, %v1329_v5  ;;  %v1511_v4 = vsel %vm900_vm10, %v1310_v56, 0  ;;  %v1508_v5 = vsel %vm900_vm10, %v1309_v57, 0 }
 0x32d   : > { %v2887_v57 = vmov 2  }
 0x32e   : > { %v1338_v10 = vsel %vm900_vm10, %v1330_v8, 0  ;;  %v1341_v11 = vsel %vm900_vm10, %v1331_v9, 0  ;;  %2861 = vset.pattern.permute.xlu0 %v2887_v57 }
 0x32f   : > { %1350 = vmatpush.bf16.msrb.mxu0 %v1338_v10  ;;  %1363 = vmatpush.bf16.msrb.mxu1 %v1341_v11  ;;  %v1456_v12 = vpop.permute.xlu0 %1455  ;;  %v1640_v2 = vpop.permute.xlu2 %1639 }
 0x330   : > { %v1457_v16 = vsel %vm546_vm5, %v1454_v7, %v1456_v12  ;;  %v1458_v17 = vsel %vm546_vm5, %v1456_v12, %v1454_v7  ;;  %v1312_v18 = vpop.permute.xlu1 %1311  ;;  %1738 = vperm.xlu0 %2861, %v3147_v6   ;;  %v2775_v6 = vld [vmem:[%s3777_s5 + $0x1c] sm:$0xf] }
 0x331   : > { %v1459_v19 = vmul.f32 %v1458_v17, %v3042_v62  ;;  %v1460_v20 = vmul.f32 %v1457_v16, %v3045_v63  ;;  %v1315_v21 = vsel %vm378_vm0, %v1312_v18, %v1314_v61  ;;  %v1316_v29 = vsel %vm378_vm0, %v1314_v61, %v1312_v18 }
 0x332   : > { %v1317_v30 = vmul.f32 %v1316_v29, %v2991_v26  ;;  %v1318_v35 = vmul.f32 %v1315_v21, %v2988_v25  ;;  %2756 = vmatmul.msk.bf16.vlgmr.msrb.gmra.mxu0 %vm896_vm11, %v2755_v15  ;;  %2757 = vmatmul.msk.bf16.vlgmr.msrb.gmra.mxu1 %vm896_vm11, %v2755_v15 }
 0x333   : > { %v1461_v36 = vpack.c.bf16 %v1459_v19, %v1459_v19  ;;  %v1462_v37 = vpack.c.bf16 %v1460_v20, %v1460_v20 }
 0x334   : > { %v1319_v38 = vpack.c.bf16 %v1317_v30, %v1317_v30  ;;  %v1320_v39 = vpack.c.bf16 %v1318_v35, %v1318_v35  ;;  %v2763_v30 = vld [vmem:[%s3777_s5 + $0xc] sm:$0xf] }
 0x335   : > { %v1469_v42 = vsel %vm900_vm10, %v1461_v36, 0  ;;  %v1472_v41 = vsel %vm900_vm10, %v1462_v37, 0 }
 0x336   : > { %v1373_v48 = vsel %vm900_vm10, %v1319_v38, 0  ;;  %v1376_v43 = vsel %vm900_vm10, %v1320_v39, 0 }
 0x337   : > { %1385 = vmatpush.bf16.msrb.mxu2 %v1373_v48  ;;  %1398 = vmatpush.bf16.msrb.mxu3 %v1376_v43  ;;  %v1591_v49 = vpop.permute.xlu0 %1590 }
 0x338   : > { %v1407_v51 = vpop.permute.xlu1 %1406 }
 0x339   : > { %v1408_v52 = vsel %vm489_vm1, %v1405_v0, %v1407_v51  ;;  %v1409_v53 = vsel %vm489_vm1, %v1407_v51, %v1405_v0  ;;  %v1691_v51 = vpop.permute.xlu2 %1690 }
 0x33a   : > { %v1410_v24 = vmul.f32 %v1409_v53, %v2999_v32  ;;  %v1411_v23 = vmul.f32 %v1408_v52, %v3002_v33  ;;  %2758 = vmatmul.msk.bf16.vlgmr.msrb.gmra.mxu2 %vm896_vm11, %v1321_v50  ;;  %2759 = vmatmul.msk.bf16.vlgmr.msrb.gmra.mxu3 %vm896_vm11, %v1321_v50  ;;  %v2766_v50 = vld [vmem:[%s3777_s5 + $0x10] sm:$0xf] }
 0x33b   : > { %1481 = vmatpush.bf16.msra.mxu2 %v1469_v42  ;;  %1494 = vmatpush.bf16.msra.mxu3 %v1472_v41 }
 0x33c   : > { %v1412_v58 = vpack.c.bf16 %v1410_v24, %v1410_v24  ;;  %v1413_v61 = vpack.c.bf16 %v1411_v23, %v1411_v23 }
 0x33e   : > { %v1420_v1 = vsel %vm900_vm10, %v1412_v58, 0  ;;  %v1423_v0 = vsel %vm900_vm10, %v1413_v61, 0 }
 0x33f   : > { %1432 = vmatpush.bf16.msra.mxu0 %v1420_v1  ;;  %1445 = vmatpush.bf16.msra.mxu1 %v1423_v0  ;;  %v1642_v3 = vpop.permute.xlu0 %1641 }
 0x340   : > { %v1643_v54 = vsel %vm756_vm8, %v1640_v2, %v1642_v3  ;;  %v1644_v7 = vsel %vm756_vm8, %v1642_v3, %v1640_v2  ;;  %v1542_v8 = vpop.permute.xlu1 %1541  ;;  %v2778_v2 = vld [vmem:[%s3777_s5 + $0x20] sm:$0xf] }
 0x341   : > { %v1645_v9 = vmul.f32 %v1643_v54, %v3102_v46  ;;  %v1545_v10 = vsel %vm642_vm6, %v1542_v8, %v1544_v40  ;;  %v1546_v11 = vsel %vm642_vm6, %v1544_v40, %v1542_v8  ;;  %v1646_v12 = vmul.f32 %v1644_v7, %v3105_v47 }
 0x342   : > { %v1547_v15 = vmul.f32 %v1545_v10, %v3064_v13  ;;  %v1548_v16 = vmul.f32 %v1546_v11, %v3067_v14  ;;  %2761 = vmatmul.msk.bf16.vlgmr.msra.gmra.mxu0 %vm896_vm11, %v2760_v55  ;;  %2762 = vmatmul.msk.bf16.vlgmr.msra.gmra.mxu1 %vm896_vm11, %v2760_v55 }
 0x343   : > { %1533 = vmatpush.bf16.msrb.mxu1 %v1511_v4  ;;  %1520 = vmatpush.bf16.msrb.mxu0 %v1508_v5  ;;  %v1647_v19 = vpack.c.bf16 %v1645_v9, %v1645_v9  ;;  %v1648_v20 = vpack.c.bf16 %v1646_v12, %v1646_v12 }
 0x344   : > { %v1549_v17 = vpack.c.bf16 %v1547_v15, %v1547_v15  ;;  %v1550_v18 = vpack.c.bf16 %v1548_v16, %v1548_v16 }
 0x345   : > { %v1655_v40 = vsel %vm900_vm10, %v1647_v19, 0  ;;  %v1658_v42 = vsel %vm900_vm10, %v1648_v20, 0 }
 0x346   : > { %v1557_v21 = vsel %vm900_vm10, %v1549_v17, 0  ;;  %v1560_v29 = vsel %vm900_vm10, %v1550_v18, 0 }
 0x347   : > { %1569 = vmatpush.bf16.msrb.mxu2 %v1557_v21  ;;  %1582 = vmatpush.bf16.msrb.mxu3 %v1560_v29 }
 0x348   : > { %v1593_v35 = vpop.permute.xlu1 %1592 }
 0x349   : > { %v1594_v36 = vsel %vm699_vm7, %v1591_v49, %v1593_v35  ;;  %v1595_v37 = vsel %vm699_vm7, %v1593_v35, %v1591_v49 }
 0x34a   : > { %v1596_v38 = vmul.f32 %v1594_v36, %v3084_v31  ;;  %v1597_v39 = vmul.f32 %v1595_v37, %v3087_v34  ;;  %2764 = vmatmul.msk.bf16.vlgmr.msra.gmra.mxu2 %vm896_vm11, %v2763_v30  ;;  %2765 = vmatmul.msk.bf16.vlgmr.msra.gmra.mxu3 %vm896_vm11, %v2763_v30 }
 0x34b   : > { %1667 = vmatpush.bf16.msra.mxu2 %v1655_v40  ;;  %1680 = vmatpush.bf16.msra.mxu3 %v1658_v42 }
 0x34c   : > { %v1598_v41 = vpack.c.bf16 %v1596_v38, %v1596_v38  ;;  %v1599_v48 = vpack.c.bf16 %v1597_v39, %v1597_v39 }
 0x34e   : > { %v1606_v43 = vsel %vm900_vm10, %v1598_v41, 0  ;;  %v1609_v49 = vsel %vm900_vm10, %v1599_v48, 0 }
 0x34f   : > { %1618 = vmatpush.bf16.msra.mxu0 %v1606_v43  ;;  %1631 = vmatpush.bf16.msra.mxu1 %v1609_v49 }
 0x350   : > { %v1689_v52 = vpop.permute.xlu1 %1688 }
 0x351   : > { %v1692_v53 = vsel %vm813_vm9, %v1689_v52, %v1691_v51  ;;  %v1693_v24 = vsel %vm813_vm9, %v1691_v51, %v1689_v52 }
 0x352   : > { %v1694_v23 = vmul.f32 %v3126_v59, %v1692_v53  ;;  %v1695_v56 = vmul.f32 %v3131_v60, %v1693_v24  ;;  %2767 = vmatmul.msk.bf16.vlgmr.msrb.gmra.mxu0 %vm896_vm11, %v2766_v50  ;;  %2768 = vmatmul.msk.bf16.vlgmr.msrb.gmra.mxu1 %vm896_vm11, %v2766_v50  ;;  %v2769_v59 = vld [vmem:[%s3777_s5 + $0x14] sm:$0xf]  ;;  %v2772_v60 = vld [vmem:[%s3777_s5 + $0x18] sm:$0xf] }
 0x354   : > { %v1696_v58 = vpack.c.bf16 %v1694_v23, %v1694_v23  ;;  %v1697_v61 = vpack.c.bf16 %v1695_v56, %v1695_v56 }
 0x356   : > { %v1704_v1 = vsel %vm900_vm10, %v1696_v58, 0  ;;  %v1707_v0 = vsel %vm900_vm10, %v1697_v61, 0 }
 0x357   : > { %1716 = vmatpush.bf16.msrb.mxu0 %v1704_v1  ;;  %1729 = vmatpush.bf16.msrb.mxu1 %v1707_v0 }
 0x35a   : > { %2770 = vmatmul.msk.bf16.vlgmr.msrb.gmra.mxu2 %vm896_vm11, %v2769_v59  ;;  %2771 = vmatmul.msk.bf16.vlgmr.msrb.gmra.mxu3 %vm896_vm11, %v2769_v59 }
 0x362   : > { %2773 = vmatmul.msk.bf16.vlgmr.msra.gmra.mxu0 %vm896_vm11, %v2772_v60  ;;  %2774 = vmatmul.msk.bf16.vlgmr.msra.gmra.mxu1 %vm896_vm11, %v2772_v60 }
 0x36a   : > { %2776 = vmatmul.msk.bf16.vlgmr.msra.gmra.mxu2 %vm896_vm11, %v2775_v6  ;;  %2777 = vmatmul.msk.bf16.vlgmr.msra.gmra.mxu3 %vm896_vm11, %v2775_v6 }
 0x372   : > { %2779 = vmatmul.msk.bf16.vlgmr.msrb.gmra.mxu0 %vm896_vm11, %v2778_v2  ;;  %2780 = vmatmul.msk.bf16.vlgmr.msrb.gmra.mxu1 %vm896_vm11, %v2778_v2 }
 0x3a2   : > { %v1739_v60 = vpop.permute.xlu0 %1738 }
 0x3af   : > { %v1352_v3 = vpop.f32.mrf.mxu0  ;;  %v1365_v4 = vpop.f32.mrf.mxu1 }
 0x3b7   : > { %v1354_v5 = vpop.f32.mrf.mxu0  ;;  %v1367_v55 = vpop.f32.mrf.mxu1 }
 0x3bd   : > { %v1387_v54 = vpop.f32.mrf.mxu2  ;;  %v1400_v7 = vpop.f32.mrf.mxu3 }
 0x3be   : > { %v1388_v35 = vadd.f32 %v1387_v54, %v1352_v3  ;;  %v1401_v36 = vadd.f32 %v1400_v7, %v1365_v4  ;;  %v1745_v54 = vld [vmem:[%s347_s24] sm:$0xff]  ;;  %v1746_v7 = vld [vmem:[%s347_s24 + $0x8] sm:$0xff] }
 0x3bf   : > { %v1434_v8 = vpop.f32.mrf.mxu0  ;;  %v1447_v9 = vpop.f32.mrf.mxu1 }
 0x3c0   : > { %v1451_v42 = vadd.f32 %v1434_v8, %v1388_v35  ;;  %v1452_v41 = vadd.f32 %v1447_v9, %v1401_v36 }
 0x3c5   : > { %v1389_v10 = vpop.f32.mrf.mxu2  ;;  %v1402_v11 = vpop.f32.mrf.mxu3 }
 0x3c7   : > { %v1436_v12 = vpop.f32.mrf.mxu0  ;;  %v1449_v15 = vpop.f32.mrf.mxu1 }
 0x3cd   : > { %v1483_v16 = vpop.f32.mrf.mxu2  ;;  %v1496_v17 = vpop.f32.mrf.mxu3 }
 0x3ce   : > { %v1500_v48 = vadd.f32 %v1483_v16, %v1451_v42  ;;  %v1501_v43 = vadd.f32 %v1496_v17, %v1452_v41  ;;  %v2781_v42 = vld [vmem:[%s3778_s6 + $0x4] sm:$0xf] }
 0x3cf   : > { %v1522_v18 = vpop.f32.mrf.mxu0  ;;  %v1535_v19 = vpop.f32.mrf.mxu1 }
 0x3d0   : > { %v1539_v51 = vadd.f32 %v1522_v18, %v1500_v48  ;;  %v1540_v52 = vadd.f32 %v1535_v19, %v1501_v43 }
 0x3d5   : > { %v1485_v20 = vpop.f32.mrf.mxu2  ;;  %v1498_v21 = vpop.f32.mrf.mxu3 }
 0x3d7   : > { %v1524_v29 = vpop.f32.mrf.mxu0  ;;  %v1537_v30 = vpop.f32.mrf.mxu1 }
 0x3dd   : > { %v1571_v37 = vpop.f32.mrf.mxu2  ;;  %v1584_v38 = vpop.f32.mrf.mxu3 }
 0x3de   : > { %v1588_v23 = vadd.f32 %v1571_v37, %v1539_v51  ;;  %v1589_v56 = vadd.f32 %v1584_v38, %v1540_v52 }
 0x3df   : > { %v1620_v39 = vpop.f32.mrf.mxu0  ;;  %v1633_v40 = vpop.f32.mrf.mxu1 }
 0x3e0   : > { %v1637_v57 = vadd.f32 %v1620_v39, %v1588_v23  ;;  %v1638_v58 = vadd.f32 %v1633_v40, %v1589_v56 }
 0x3e5   : > { %v1573_v49 = vpop.f32.mrf.mxu2  ;;  %v1586_v50 = vpop.f32.mrf.mxu3 }
 0x3e7   : > { %v1622_v53 = vpop.f32.mrf.mxu0  ;;  %v1635_v24 = vpop.f32.mrf.mxu1 }
 0x3ed   : > { %v1669_v61 = vpop.f32.mrf.mxu2  ;;  %v1682_v1 = vpop.f32.mrf.mxu3 }
 0x3ee   : > { %v1686_v0 = vadd.f32 %v1669_v61, %v1637_v57  ;;  %v1687_v59 = vadd.f32 %v1682_v1, %v1638_v58 }
 0x3ef   : > { %v1718_v6 = vpop.f32.mrf.mxu0  ;;  %v1731_v2 = vpop.f32.mrf.mxu1 }
 0x3f0   : > { %v1735_v3 = vadd.f32 %v1718_v6, %v1686_v0  ;;  %v1736_v4 = vadd.f32 %v1731_v2, %v1687_v59 }
 0x3f2   : > { %v1741_v5 = vadd.f32 %v1739_v60, %v1735_v3  ;;  %v1742_v55 = vadd.f32 %v1739_v60, %v1736_v4 }
 0x3f4   : > { %v1743_v8 = vadd.f32 %v1741_v5, %v3167_v27  ;;  %v1744_v9 = vadd.f32 %v1742_v55, %v3169_v28 }
 0x3f5   : > { %v1671_v10 = vpop.f32.mrf.mxu2  ;;  %v1684_v11 = vpop.f32.mrf.mxu3 }
 0x3f6   : > { %v3461_v12 = vadd.f32 %v1745_v54, %v1743_v8  ;;  %v3463_v15 = vadd.f32 %v1746_v7, %v1744_v9 }
 0x3f7   : > { %v1720_v16 = vpop.f32.mrf.mxu0  ;;  %v1733_v17 = vpop.f32.mrf.mxu1 }
 0x3f8   : > { %v1749_v18 = vmax.f32 %v3461_v12, 0.0  ;;  %v1750_v19 = vmax.f32 %v3463_v15, 0.0 }
 0x3fa   : > { %1766 = vrot.lane.b32.xlu2 %v1750_v19, %s2878_s16  ;;  %1753 = vrot.lane.b32.xlu0 %v1749_v18, %s2877_s15  ;;  %v1752_v53 = vpack.c.bf16 %v1750_v19, %v1750_v19  ;;  %v1751_v24 = vpack.c.bf16 %v1749_v18, %v1749_v18 }
 0x3fb   : > { %1764 = vrot.lane.b32.xlu1 %v1749_v18, %s2878_s16 }
 0x3fc   : > { %v1953_v60 = vsel %vm900_vm10, %v1752_v53, 0  ;;  %v1950_v6 = vsel %vm900_vm10, %v1751_v24, 0  ;;  %v3553_v53 = vld [vmem:[%s3774_s2 + $0x10] ss:$0 sm:$0xff] }
 0x402   : > { %1848 = vrot.lane.b32.xlu2 %v1750_v19, %s2879_s17  ;;  %1897 = vrot.lane.b32.xlu0 %v1750_v19, %s2880_s18 }
 0x403   : > { %1846 = vrot.lane.b32.xlu1 %v1749_v18, %s2879_s17 }
 0x40a   : > { %1895 = vrot.lane.b32.xlu2 %v1749_v18, %s2880_s18  ;;  %1983 = vrot.lane.b32.xlu0 %v1749_v18, %s2881_s19 }
 0x40b   : > { %1755 = vrot.lane.b32.xlu1 %v1750_v19, %s2877_s15 }
 0x412   : > { %2034 = vrot.lane.b32.xlu2 %v1750_v19, %s2882_s20  ;;  %2132 = vrot.lane.b32.xlu0 %v1750_v19, %s2884_s22 }
 0x413   : > { %2032 = vrot.lane.b32.xlu1 %v1749_v18, %s2882_s20 }
 0x41a   : > { %2130 = vrot.lane.b32.xlu2 %v1749_v18, %s2884_s22 }
 0x41b   : > { %1985 = vrot.lane.b32.xlu1 %v1750_v19, %s2881_s19 }
 0x422   : > { %2083 = vrot.lane.b32.xlu2 %v1750_v19, %s2883_s21 }
 0x423   : > { %2081 = vrot.lane.b32.xlu1 %v1749_v18, %s2883_s21 }
 0x454   : > { %v1767_v27 = vpop.permute.xlu2 %1766 }
 0x45c   : > { %v1849_v20 = vpop.permute.xlu2 %1848 }
 0x464   : > { %v1896_v50 = vpop.permute.xlu2 %1895 }
 0x46c   : > { %v1754_v28 = vpop.permute.xlu0 %1753  ;;  %v2035_v9 = vpop.permute.xlu2 %2034 }
 0x46d   : > { %v1765_v21 = vpop.permute.xlu1 %1764 }
 0x46e   : > { %v1768_v29 = vsel %vm397_vm3, %v1765_v21, %v1767_v27  ;;  %v1769_v30 = vsel %vm397_vm3, %v1767_v27, %v1765_v21  ;;  %v1763_v27 = vld [vmem:[%s3778_s6] sm:$0xf] }
 0x46f   : > { %v1770_v35 = vmul.f32 %v1769_v30, %v3016_v44  ;;  %v1771_v36 = vmul.f32 %v1768_v29, %v3019_v45 }
 0x471   : > { %v1772_v37 = vpack.c.bf16 %v1770_v35, %v1770_v35  ;;  %v1773_v38 = vpack.c.bf16 %v1771_v36, %v1771_v36 }
 0x473   : > { %v1780_v39 = vsel %vm900_vm10, %v1772_v37, 0  ;;  %v1783_v40 = vsel %vm900_vm10, %v1773_v38, 0 }
 0x474   : > { %1792 = vmatpush.bf16.msrb.mxu2 %v1780_v39  ;;  %1805 = vmatpush.bf16.msrb.mxu3 %v1783_v40  ;;  %v1898_v48 = vpop.permute.xlu0 %1897  ;;  %v2131_v39 = vpop.permute.xlu2 %2130 }
 0x475   : > { %v1847_v41 = vpop.permute.xlu1 %1846  ;;  %v1899_v23 = vsel %vm546_vm5, %v1896_v50, %v1898_v48  ;;  %v1900_v56 = vsel %vm546_vm5, %v1898_v48, %v1896_v50 }
 0x476   : > { %v1850_v43 = vsel %vm489_vm1, %v1847_v41, %v1849_v20  ;;  %v1851_v49 = vsel %vm489_vm1, %v1849_v20, %v1847_v41  ;;  %v1901_v0 = vmul.f32 %v1900_v56, %v3042_v62  ;;  %v1902_v59 = vmul.f32 %v1899_v23, %v3045_v63  ;;  %v2786_v20 = vld [vmem:[%s3778_s6 + $0x8] sm:$0xf]  ;;  %v3559_v23 = vld [vmem:[%s3774_s2 + $0x18] ss:$0 sm:$0xff] }
 0x477   : > { %v1852_v51 = vmul.f32 %v1851_v49, %v2999_v32  ;;  %v1853_v52 = vmul.f32 %v1850_v43, %v3002_v33  ;;  %2782 = vmatmul.msk.bf16.vlgmr.msrb.gmra.mxu2 %vm896_vm11, %v2781_v42  ;;  %2783 = vmatmul.msk.bf16.vlgmr.msrb.gmra.mxu3 %vm896_vm11, %v2781_v42 }
 0x478   : > { %v1903_v54 = vpack.c.bf16 %v1901_v0, %v1901_v0  ;;  %v1904_v7 = vpack.c.bf16 %v1902_v59, %v1902_v59 }
 0x479   : > { %v1854_v57 = vpack.c.bf16 %v1852_v51, %v1852_v51  ;;  %v1855_v58 = vpack.c.bf16 %v1853_v52, %v1853_v52 }
 0x47a   : > { %v1911_v18 = vsel %vm900_vm10, %v1903_v54, 0  ;;  %v1914_v19 = vsel %vm900_vm10, %v1904_v7, 0 }
 0x47b   : > { %v1862_v61 = vsel %vm900_vm10, %v1854_v57, 0  ;;  %v1865_v1 = vsel %vm900_vm10, %v1855_v58, 0 }
 0x47c   : > { %1874 = vmatpush.bf16.msra.mxu2 %v1862_v61  ;;  %1887 = vmatpush.bf16.msra.mxu3 %v1865_v1  ;;  %v1984_v8 = vpop.permute.xlu0 %1983 }
 0x47d   : > { %v1756_v2 = vpop.permute.xlu1 %1755 }
 0x47e   : > { %v1757_v3 = vsel %vm378_vm0, %v1754_v28, %v1756_v2  ;;  %v1758_v4 = vsel %vm378_vm0, %v1756_v2, %v1754_v28 }
 0x47f   : > { %v1759_v5 = vmul.f32 %v1758_v4, %v2991_v26  ;;  %v1760_v55 = vmul.f32 %v1757_v3, %v2988_v25  ;;  %v2792_v3 = vld [vmem:[%s3778_s6 + $0x10] sm:$0xf] }
 0x480   : > { %1975 = vmatpush.bf16.msrb.mxu3 %v1953_v60  ;;  %1962 = vmatpush.bf16.msrb.mxu2 %v1950_v6  ;;  %v2789_v60 = vld [vmem:[%s3778_s6 + $0xc] sm:$0xf]  ;;  %v2084_v6 = vpop.permute.xlu2 %2083 }
 0x481   : > { %v1761_v10 = vpack.c.bf16 %v1759_v5, %v1759_v5  ;;  %v1762_v11 = vpack.c.bf16 %v1760_v55, %v1760_v55 }
 0x483   : > { %v1815_v16 = vsel %vm900_vm10, %v1761_v10, 0  ;;  %v1818_v17 = vsel %vm900_vm10, %v1762_v11, 0  ;;  %v2888_v11 = vmov 3  }
 0x484   : > { %1827 = vmatpush.bf16.msra.mxu0 %v1815_v16  ;;  %1840 = vmatpush.bf16.msra.mxu1 %v1818_v17  ;;  %v2133_v38 = vpop.permute.xlu0 %2132 }
 0x485   : > { %v2033_v28 = vpop.permute.xlu1 %2032  ;;  %v2134_v41 = vsel %vm813_vm9, %v2131_v39, %v2133_v38  ;;  %v2135_v48 = vsel %vm813_vm9, %v2133_v38, %v2131_v39  ;;  %2862 = vset.pattern.permute.xlu0 %v2888_v11 }
 0x486   : > { %v2036_v21 = vsel %vm699_vm7, %v2033_v28, %v2035_v9  ;;  %v2037_v29 = vsel %vm699_vm7, %v2035_v9, %v2033_v28  ;;  %v2136_v24 = vmul.f32 %v3553_v53, %v2134_v41  ;;  %v2137_v56 = vmul.f32 %v3559_v23, %v2135_v48  ;;  %v2801_v28 = vld [vmem:[%s3778_s6 + $0x1c] sm:$0xf] }
 0x487   : > { %v2038_v30 = vmul.f32 %v2036_v21, %v3084_v31  ;;  %v2039_v35 = vmul.f32 %v2037_v29, %v3087_v34  ;;  %2784 = vmatmul.msk.bf16.vlgmr.msra.gmra.mxu0 %vm896_vm11, %v1763_v27  ;;  %2785 = vmatmul.msk.bf16.vlgmr.msra.gmra.mxu1 %vm896_vm11, %v1763_v27  ;;  %v2798_v27 = vld [vmem:[%s3778_s6 + $0x18] sm:$0xf] }
 0x488   : > { %1923 = vmatpush.bf16.msrb.mxu0 %v1911_v18  ;;  %1936 = vmatpush.bf16.msrb.mxu1 %v1914_v19  ;;  %v2138_v0 = vpack.c.bf16 %v2136_v24, %v2136_v24  ;;  %v2139_v59 = vpack.c.bf16 %v2137_v56, %v2137_v56  ;;  %v3587_v18 = vld [vmem:[%s3780_s8] sm:$0xff]  ;;  %v2795_v19 = vld [vmem:[%s3778_s6 + $0x14] sm:$0xf] }
 0x489   : > { %2787 = vmatmul.msk.bf16.vlgmr.msra.gmra.mxu2 %vm896_vm11, %v2786_v20  ;;  %2788 = vmatmul.msk.bf16.vlgmr.msra.gmra.mxu3 %vm896_vm11, %v2786_v20  ;;  %v2040_v36 = vpack.c.bf16 %v2038_v30, %v2038_v30  ;;  %v2041_v37 = vpack.c.bf16 %v2039_v35, %v2039_v35  ;;  %v2804_v20 = vld [vmem:[%s3778_s6 + $0x20] sm:$0xf] }
 0x48a   : > { %v2146_v7 = vsel %vm900_vm10, %v2138_v0, 0  ;;  %2180 = vperm.xlu0 %2862, %v3587_v18  }
 0x48b   : > { %v2048_v40 = vsel %vm900_vm10, %v2040_v36, 0  ;;  %v2051_v42 = vsel %vm900_vm10, %v2041_v37, 0 }
 0x48c   : > { %2060 = vmatpush.bf16.msra.mxu2 %v2048_v40  ;;  %2073 = vmatpush.bf16.msra.mxu3 %v2051_v42 }
 0x48d   : > { %v1986_v43 = vpop.permute.xlu1 %1985 }
 0x48e   : > { %v1987_v49 = vsel %vm642_vm6, %v1984_v8, %v1986_v43  ;;  %v1988_v50 = vsel %vm642_vm6, %v1986_v43, %v1984_v8  ;;  %v2149_v8 = vsel %vm900_vm10, %v2139_v59, 0 }
 0x48f   : > { %v1989_v51 = vmul.f32 %v1987_v49, %v3064_v13  ;;  %v1990_v52 = vmul.f32 %v1988_v50, %v3067_v14 }
 0x491   : > { %v1991_v57 = vpack.c.bf16 %v1989_v51, %v1989_v51  ;;  %v1992_v58 = vpack.c.bf16 %v1990_v52, %v1990_v52 }
 0x493   : > { %v1999_v61 = vsel %vm900_vm10, %v1991_v57, 0  ;;  %v2002_v1 = vsel %vm900_vm10, %v1992_v58, 0 }
 0x494   : > { %2011 = vmatpush.bf16.msra.mxu0 %v1999_v61  ;;  %2024 = vmatpush.bf16.msra.mxu1 %v2002_v1 }
 0x495   : > { %v2082_v2 = vpop.permute.xlu1 %2081 }
 0x496   : > { %v2085_v4 = vsel %vm756_vm8, %v2082_v2, %v2084_v6  ;;  %v2086_v5 = vsel %vm756_vm8, %v2084_v6, %v2082_v2 }
 0x497   : > { %v2087_v55 = vmul.f32 %v2085_v4, %v3102_v46  ;;  %v2088_v54 = vmul.f32 %v2086_v5, %v3105_v47  ;;  %2790 = vmatmul.msk.bf16.vlgmr.msrb.gmra.mxu0 %vm896_vm11, %v2789_v60  ;;  %2791 = vmatmul.msk.bf16.vlgmr.msrb.gmra.mxu1 %vm896_vm11, %v2789_v60 }
 0x499   : > { %2793 = vmatmul.msk.bf16.vlgmr.msrb.gmra.mxu2 %vm896_vm11, %v2792_v3  ;;  %2794 = vmatmul.msk.bf16.vlgmr.msrb.gmra.mxu3 %vm896_vm11, %v2792_v3  ;;  %v2089_v9 = vpack.c.bf16 %v2087_v55, %v2087_v55  ;;  %v2090_v10 = vpack.c.bf16 %v2088_v54, %v2088_v54 }
 0x49a   : > { %2158 = vmatpush.bf16.msrb.mxu2 %v2146_v7  ;;  %2171 = vmatpush.bf16.msrb.mxu3 %v2149_v8 }
 0x49b   : > { %v2097_v16 = vsel %vm900_vm10, %v2089_v9, 0  ;;  %v2100_v17 = vsel %vm900_vm10, %v2090_v10, 0 }
 0x49c   : > { %2109 = vmatpush.bf16.msrb.mxu0 %v2097_v16  ;;  %2122 = vmatpush.bf16.msrb.mxu1 %v2100_v17 }
 0x4a7   : > { %2796 = vmatmul.msk.bf16.vlgmr.msra.gmra.mxu0 %vm896_vm11, %v2795_v19  ;;  %2797 = vmatmul.msk.bf16.vlgmr.msra.gmra.mxu1 %vm896_vm11, %v2795_v19 }
 0x4a9   : > { %2799 = vmatmul.msk.bf16.vlgmr.msra.gmra.mxu2 %vm896_vm11, %v2798_v27  ;;  %2800 = vmatmul.msk.bf16.vlgmr.msra.gmra.mxu3 %vm896_vm11, %v2798_v27 }
 0x4b7   : > { %2802 = vmatmul.msk.bf16.vlgmr.msrb.gmra.mxu0 %vm896_vm11, %v2801_v28  ;;  %2803 = vmatmul.msk.bf16.vlgmr.msrb.gmra.mxu1 %vm896_vm11, %v2801_v28 }
 0x4b9   : > { %2805 = vmatmul.msk.bf16.vlgmr.msrb.gmra.mxu2 %vm896_vm11, %v2804_v20  ;;  %2806 = vmatmul.msk.bf16.vlgmr.msrb.gmra.mxu3 %vm896_vm11, %v2804_v20 }
 0x4fa   : > { %v1794_v21 = vpop.f32.mrf.mxu2  ;;  %v1807_v29 = vpop.f32.mrf.mxu3 }
 0x502   : > { %v1796_v30 = vpop.f32.mrf.mxu2  ;;  %v1809_v35 = vpop.f32.mrf.mxu3 }
 0x504   : > { %v1829_v36 = vpop.f32.mrf.mxu0  ;;  %v1842_v37 = vpop.f32.mrf.mxu1 }
 0x505   : > { %v1843_v59 = vadd.f32 %v1842_v37, %v1807_v29  ;;  %v1830_v2 = vadd.f32 %v1829_v36, %v1794_v21  ;;  %v2181_v29 = vpop.permute.xlu0 %2180 }
 0x50c   : > { %v1876_v38 = vpop.f32.mrf.mxu2  ;;  %v1889_v39 = vpop.f32.mrf.mxu3 }
 0x50d   : > { %v1831_v40 = vpop.f32.mrf.mxu0  ;;  %v1844_v42 = vpop.f32.mrf.mxu1  ;;  %v1893_v3 = vadd.f32 %v1876_v38, %v1830_v2  ;;  %v1894_v4 = vadd.f32 %v1889_v39, %v1843_v59  ;;  %v2807_v2 = vld [vmem:[%s3779_s7 + $0x4] sm:$0xf] }
 0x514   : > { %v1878_v41 = vpop.f32.mrf.mxu2  ;;  %v1891_v48 = vpop.f32.mrf.mxu3 }
 0x515   : > { %v1925_v43 = vpop.f32.mrf.mxu0  ;;  %v1938_v49 = vpop.f32.mrf.mxu1 }
 0x516   : > { %v1942_v5 = vadd.f32 %v1925_v43, %v1893_v3  ;;  %v1943_v55 = vadd.f32 %v1938_v49, %v1894_v4 }
 0x51c   : > { %v1964_v50 = vpop.f32.mrf.mxu2  ;;  %v1977_v51 = vpop.f32.mrf.mxu3 }
 0x51d   : > { %v1927_v52 = vpop.f32.mrf.mxu0  ;;  %v1940_v24 = vpop.f32.mrf.mxu1  ;;  %v1981_v8 = vadd.f32 %v1964_v50, %v1942_v5  ;;  %v1982_v9 = vadd.f32 %v1977_v51, %v1943_v55 }
 0x524   : > { %v1966_v56 = vpop.f32.mrf.mxu2  ;;  %v1979_v57 = vpop.f32.mrf.mxu3 }
 0x525   : > { %v2013_v58 = vpop.f32.mrf.mxu0  ;;  %v2026_v61 = vpop.f32.mrf.mxu1 }
 0x526   : > { %v2030_v16 = vadd.f32 %v2013_v58, %v1981_v8  ;;  %v2031_v17 = vadd.f32 %v2026_v61, %v1982_v9 }
 0x52c   : > { %v2062_v1 = vpop.f32.mrf.mxu2  ;;  %v2075_v0 = vpop.f32.mrf.mxu3 }
 0x52d   : > { %v2015_v60 = vpop.f32.mrf.mxu0  ;;  %v2028_v6 = vpop.f32.mrf.mxu1  ;;  %v2079_v19 = vadd.f32 %v2062_v1, %v2030_v16  ;;  %v2080_v27 = vadd.f32 %v2075_v0, %v2031_v17 }
 0x534   : > { %v2064_v54 = vpop.f32.mrf.mxu2  ;;  %v2077_v7 = vpop.f32.mrf.mxu3 }
 0x535   : > { %v2111_v10 = vpop.f32.mrf.mxu0  ;;  %v2124_v11 = vpop.f32.mrf.mxu1 }
 0x536   : > { %v2128_v28 = vadd.f32 %v2111_v10, %v2079_v19  ;;  %v2129_v20 = vadd.f32 %v2124_v11, %v2080_v27 }
 0x53c   : > { %v2160_v30 = vpop.f32.mrf.mxu2  ;;  %v2173_v35 = vpop.f32.mrf.mxu3 }
 0x53d   : > { %v2177_v21 = vadd.f32 %v2160_v30, %v2128_v28  ;;  %v2178_v36 = vadd.f32 %v2173_v35, %v2129_v20  ;;  %v2113_v37 = vpop.f32.mrf.mxu0  ;;  %v2126_v38 = vpop.f32.mrf.mxu1 }
 0x53f   : > { %v2183_v39 = vadd.f32 %v2181_v29, %v2177_v21  ;;  %v2184_v40 = vadd.f32 %v2181_v29, %v2178_v36 }
 0x541   : > { %v3610_v42 = vmax.f32 %v2183_v39, 0.0  ;;  %v3612_v41 = vmax.f32 %v2184_v40, 0.0 }
 0x543   : > { %2202 = vrot.lane.b32.xlu2 %v3612_v41, %s2878_s16  ;;  %2282 = vrot.lane.b32.xlu0 %v3610_v42, %s2879_s17  ;;  %v2188_v21 = vpack.c.bf16 %v3612_v41, %v3612_v41  ;;  %v2187_v36 = vpack.c.bf16 %v3610_v42, %v3610_v42 }
 0x544   : > { %2200 = vrot.lane.b32.xlu1 %v3610_v42, %s2878_s16  ;;  %v2162_v48 = vpop.f32.mrf.mxu2  ;;  %v2175_v43 = vpop.f32.mrf.mxu3 }
 0x545   : > { %v2386_v43 = vsel %vm900_vm10, %v2187_v36, 0 }
 0x54b   : > { %2191 = vrot.lane.b32.xlu2 %v3612_v41, %s2877_s15  ;;  %2333 = vrot.lane.b32.xlu0 %v3612_v41, %s2880_s18 }
 0x54c   : > { %2189 = vrot.lane.b32.xlu1 %v3610_v42, %s2877_s15 }
 0x553   : > { %2331 = vrot.lane.b32.xlu2 %v3610_v42, %s2880_s18  ;;  %2468 = vrot.lane.b32.xlu0 %v3610_v42, %s2882_s20 }
 0x554   : > { %2284 = vrot.lane.b32.xlu1 %v3612_v41, %s2879_s17  ;;  %s352_s17 = scalar_lea.vmem %s3781_s9, %s2836_s13 }
 0x55b   : > { %2421 = vrot.lane.b32.xlu2 %v3612_v41, %s2881_s19  ;;  %2519 = vrot.lane.b32.xlu0 %v3612_v41, %s2883_s21 }
 0x55c   : > { %2419 = vrot.lane.b32.xlu1 %v3610_v42, %s2881_s19 }
 0x563   : > { %2517 = vrot.lane.b32.xlu2 %v3610_v42, %s2883_s21 }
 0x564   : > { %2470 = vrot.lane.b32.xlu1 %v3612_v41, %s2882_s20 }
 0x56b   : > { %2568 = vrot.lane.b32.xlu2 %v3612_v41, %s2884_s22  ;;  %v2812_v41 = vld [vmem:[%s3779_s7 + $0x8] sm:$0xf] }
 0x56c   : > { %2566 = vrot.lane.b32.xlu1 %v3610_v42, %s2884_s22 }
 0x59d   : > { %v2203_v49 = vpop.permute.xlu2 %2202 }
 0x5a5   : > { %v2192_v50 = vpop.permute.xlu2 %2191 }
 0x5ad   : > { %v2332_v61 = vpop.permute.xlu2 %2331 }
 0x5b5   : > { %v2283_v51 = vpop.permute.xlu0 %2282  ;;  %v2422_v16 = vpop.permute.xlu2 %2421 }
 0x5b6   : > { %v2201_v52 = vpop.permute.xlu1 %2200 }
 0x5b7   : > { %v2204_v24 = vsel %vm397_vm3, %v2201_v52, %v2203_v49  ;;  %v2205_v56 = vsel %vm397_vm3, %v2203_v49, %v2201_v52 }
 0x5b8   : > { %v2206_v57 = vmul.f32 %v2205_v56, %v3016_v44  ;;  %v2207_v58 = vmul.f32 %v2204_v24, %v3019_v45 }
 0x5ba   : > { %v2208_v1 = vpack.c.bf16 %v2206_v57, %v2206_v57  ;;  %v2209_v0 = vpack.c.bf16 %v2207_v58, %v2207_v58 }
 0x5bc   : > { %v2216_v59 = vsel %vm900_vm10, %v2208_v1, 0  ;;  %v2219_v60 = vsel %vm900_vm10, %v2209_v0, 0 }
 0x5bd   : > { %2228 = vmatpush.bf16.msra.mxu0 %v2216_v59  ;;  %2241 = vmatpush.bf16.msra.mxu1 %v2219_v60  ;;  %v2334_v6 = vpop.permute.xlu0 %2333  ;;  %v2518_v48 = vpop.permute.xlu2 %2517 }
 0x5be   : > { %v2335_v3 = vsel %vm546_vm5, %v2332_v61, %v2334_v6  ;;  %v2336_v44 = vsel %vm546_vm5, %v2334_v6, %v2332_v61  ;;  %v2190_v45 = vpop.permute.xlu1 %2189 }
 0x5bf   : > { %v2337_v4 = vmul.f32 %v2336_v44, %v3042_v62  ;;  %v2338_v5 = vmul.f32 %v2335_v3, %v3045_v63  ;;  %v2193_v55 = vsel %vm378_vm0, %v2190_v45, %v2192_v50  ;;  %v2194_v54 = vsel %vm378_vm0, %v2192_v50, %v2190_v45 }
 0x5c0   : > { %v2195_v7 = vmul.f32 %v2194_v54, %v2991_v26  ;;  %v2196_v8 = vmul.f32 %v2193_v55, %v2988_v25  ;;  %2808 = vmatmul.msk.bf16.vlgmr.msra.gmra.mxu0 %vm896_vm11, %v2807_v2  ;;  %2809 = vmatmul.msk.bf16.vlgmr.msra.gmra.mxu1 %vm896_vm11, %v2807_v2  ;;  %v2199_v26 = vld [vmem:[%s3779_s7] sm:$0xf] }
 0x5c1   : > { %v2339_v9 = vpack.c.bf16 %v2337_v4, %v2337_v4  ;;  %v2340_v10 = vpack.c.bf16 %v2338_v5, %v2338_v5 }
 0x5c2   : > { %v2197_v11 = vpack.c.bf16 %v2195_v7, %v2195_v7  ;;  %v2198_v62 = vpack.c.bf16 %v2196_v8, %v2196_v8 }
 0x5c3   : > { %v2347_v63 = vsel %vm900_vm10, %v2339_v9, 0  ;;  %v2350_v17 = vsel %vm900_vm10, %v2340_v10, 0 }
 0x5c4   : > { %v2251_v19 = vsel %vm900_vm10, %v2197_v11, 0  ;;  %v2254_v27 = vsel %vm900_vm10, %v2198_v62, 0  ;;  %v2889_v62 = vmov 4  }
 0x5c5   : > { %2263 = vmatpush.bf16.msra.mxu2 %v2251_v19  ;;  %2276 = vmatpush.bf16.msra.mxu3 %v2254_v27  ;;  %v2469_v25 = vpop.permute.xlu0 %2468 }
 0x5c6   : > { %v2285_v28 = vpop.permute.xlu1 %2284  ;;  %2863 = vset.pattern.permute.xlu0 %v2889_v62 }
 0x5c7   : > { %v2286_v20 = vsel %vm489_vm1, %v2283_v51, %v2285_v28  ;;  %v2287_v29 = vsel %vm489_vm1, %v2285_v28, %v2283_v51  ;;  %2616 = vperm.xlu0 %2863, %v3587_v18   ;;  %v2830_v18 = vld [vmem:[%s3779_s7 + $0x20] sm:$0xf] }
 0x5c8   : > { %v2288_v30 = vmul.f32 %v2287_v29, %v2999_v32  ;;  %v2289_v35 = vmul.f32 %v2286_v20, %v3002_v33  ;;  %2810 = vmatmul.msk.bf16.vlgmr.msra.gmra.mxu2 %vm896_vm11, %v2199_v26  ;;  %2811 = vmatmul.msk.bf16.vlgmr.msra.gmra.mxu3 %vm896_vm11, %v2199_v26  ;;  %v2389_v33 = vsel %vm900_vm10, %v2188_v21, 0 }
 0x5c9   : > { %2359 = vmatpush.bf16.msrb.mxu2 %v2347_v63  ;;  %2372 = vmatpush.bf16.msrb.mxu3 %v2350_v17 }
 0x5ca   : > { %v2290_v37 = vpack.c.bf16 %v2288_v30, %v2288_v30  ;;  %v2291_v38 = vpack.c.bf16 %v2289_v35, %v2289_v35 }
 0x5cc   : > { %v2298_v39 = vsel %vm900_vm10, %v2290_v37, 0  ;;  %v2301_v40 = vsel %vm900_vm10, %v2291_v38, 0 }
 0x5cd   : > { %2310 = vmatpush.bf16.msrb.mxu0 %v2298_v39  ;;  %2323 = vmatpush.bf16.msrb.mxu1 %v2301_v40  ;;  %v2520_v32 = vpop.permute.xlu0 %2519 }
 0x5ce   : > { %v2521_v42 = vsel %vm756_vm8, %v2518_v48, %v2520_v32  ;;  %v2522_v49 = vsel %vm756_vm8, %v2520_v32, %v2518_v48  ;;  %v2420_v50 = vpop.permute.xlu1 %2419 }
 0x5cf   : > { %v2523_v51 = vmul.f32 %v2521_v42, %v3102_v46  ;;  %v2423_v52 = vsel %vm642_vm6, %v2420_v50, %v2422_v16  ;;  %v2424_v24 = vsel %vm642_vm6, %v2422_v16, %v2420_v50  ;;  %v2524_v56 = vmul.f32 %v2522_v49, %v3105_v47 }
 0x5d0   : > { %v2425_v57 = vmul.f32 %v2423_v52, %v3064_v13  ;;  %v2426_v58 = vmul.f32 %v2424_v24, %v3067_v14  ;;  %2813 = vmatmul.msk.bf16.vlgmr.msrb.gmra.mxu0 %vm896_vm11, %v2812_v41  ;;  %2814 = vmatmul.msk.bf16.vlgmr.msrb.gmra.mxu1 %vm896_vm11, %v2812_v41  ;;  %v2815_v13 = vld [vmem:[%s3779_s7 + $0xc] sm:$0xf] }
 0x5d1   : > { %2411 = vmatpush.bf16.msra.mxu1 %v2389_v33  ;;  %2398 = vmatpush.bf16.msra.mxu0 %v2386_v43  ;;  %v2525_v0 = vpack.c.bf16 %v2523_v51, %v2523_v51  ;;  %v2526_v46 = vpack.c.bf16 %v2524_v56, %v2524_v56 }
 0x5d2   : > { %v2427_v61 = vpack.c.bf16 %v2425_v57, %v2425_v57  ;;  %v2428_v1 = vpack.c.bf16 %v2426_v58, %v2426_v58 }
 0x5d3   : > { %v2533_v44 = vsel %vm900_vm10, %v2525_v0, 0  ;;  %v2536_v45 = vsel %vm900_vm10, %v2526_v46, 0 }
 0x5d4   : > { %v2435_v59 = vsel %vm900_vm10, %v2427_v61, 0  ;;  %v2438_v60 = vsel %vm900_vm10, %v2428_v1, 0 }
 0x5d5   : > { %2447 = vmatpush.bf16.msra.mxu2 %v2435_v59  ;;  %2460 = vmatpush.bf16.msra.mxu3 %v2438_v60 }
 0x5d6   : > { %v2471_v47 = vpop.permute.xlu1 %2470 }
 0x5d7   : > { %v2472_v14 = vsel %vm699_vm7, %v2469_v25, %v2471_v47  ;;  %v2473_v6 = vsel %vm699_vm7, %v2471_v47, %v2469_v25 }
 0x5d8   : > { %v2474_v2 = vmul.f32 %v2472_v14, %v3084_v31  ;;  %v2475_v3 = vmul.f32 %v2473_v6, %v3087_v34  ;;  %2816 = vmatmul.msk.bf16.vlgmr.msrb.gmra.mxu2 %vm896_vm11, %v2815_v13  ;;  %2817 = vmatmul.msk.bf16.vlgmr.msrb.gmra.mxu3 %vm896_vm11, %v2815_v13  ;;  %v2818_v31 = vld [vmem:[%s3779_s7 + $0x10] sm:$0xf]  ;;  %v2569_v34 = vpop.permute.xlu2 %2568 }
 0x5d9   : > { %2545 = vmatpush.bf16.msrb.mxu2 %v2533_v44  ;;  %2558 = vmatpush.bf16.msrb.mxu3 %v2536_v45 }
 0x5da   : > { %v2476_v4 = vpack.c.bf16 %v2474_v2, %v2474_v2  ;;  %v2477_v5 = vpack.c.bf16 %v2475_v3, %v2475_v3 }
 0x5dc   : > { %v2484_v55 = vsel %vm900_vm10, %v2476_v4, 0  ;;  %v2487_v54 = vsel %vm900_vm10, %v2477_v5, 0 }
 0x5dd   : > { %2496 = vmatpush.bf16.msrb.mxu0 %v2484_v55  ;;  %2509 = vmatpush.bf16.msrb.mxu1 %v2487_v54 }
 0x5de   : > { %v2567_v7 = vpop.permute.xlu1 %2566 }
 0x5df   : > { %v2570_v8 = vsel %vm813_vm9, %v2567_v7, %v2569_v34  ;;  %v2571_v9 = vsel %vm813_vm9, %v2569_v34, %v2567_v7 }
 0x5e0   : > { %v2572_v10 = vmul.f32 %v3553_v53, %v2570_v8  ;;  %v2573_v11 = vmul.f32 %v3559_v23, %v2571_v9  ;;  %2819 = vmatmul.msk.bf16.vlgmr.msra.gmra.mxu0 %vm896_vm11, %v2818_v31  ;;  %2820 = vmatmul.msk.bf16.vlgmr.msra.gmra.mxu1 %vm896_vm11, %v2818_v31  ;;  %v2824_v53 = vld [vmem:[%s3779_s7 + $0x18] sm:$0xf]  ;;  %v2827_v23 = vld [vmem:[%s3779_s7 + $0x1c] sm:$0xf] }
 0x5e2   : > { %v2574_v16 = vpack.c.bf16 %v2572_v10, %v2572_v10  ;;  %v2575_v63 = vpack.c.bf16 %v2573_v11, %v2573_v11 }
 0x5e4   : > { %v2582_v17 = vsel %vm900_vm10, %v2574_v16, 0  ;;  %v2585_v19 = vsel %vm900_vm10, %v2575_v63, 0 }
 0x5e5   : > { %2594 = vmatpush.bf16.msra.mxu0 %v2582_v17  ;;  %2607 = vmatpush.bf16.msra.mxu1 %v2585_v19 }
 0x5e8   : > { %2822 = vmatmul.msk.bf16.vlgmr.msra.gmra.mxu2 %vm896_vm11, %v2821_v22  ;;  %2823 = vmatmul.msk.bf16.vlgmr.msra.gmra.mxu3 %vm896_vm11, %v2821_v22 }
 0x5f0   : > { %2825 = vmatmul.msk.bf16.vlgmr.msrb.gmra.mxu0 %vm896_vm11, %v2824_v53  ;;  %2826 = vmatmul.msk.bf16.vlgmr.msrb.gmra.mxu1 %vm896_vm11, %v2824_v53 }
 0x5f8   : > { %2828 = vmatmul.msk.bf16.vlgmr.msrb.gmra.mxu2 %vm896_vm11, %v2827_v23  ;;  %2829 = vmatmul.msk.bf16.vlgmr.msrb.gmra.mxu3 %vm896_vm11, %v2827_v23 }
 0x600   : > { %2831 = vmatmul.msk.bf16.vlgmr.msra.gmra.mxu0 %vm896_vm11, %v2830_v18  ;;  %2832 = vmatmul.msk.bf16.vlgmr.msra.gmra.mxu1 %vm896_vm11, %v2830_v18 }
 0x639   : > { %v2617_v55 = vpop.permute.xlu0 %2616 }
 0x63d   : > { %v2230_v27 = vpop.f32.mrf.mxu0  ;;  %v2243_v25 = vpop.f32.mrf.mxu1 }
 0x645   : > { %v2232_v26 = vpop.f32.mrf.mxu0  ;;  %v2245_v28 = vpop.f32.mrf.mxu1 }
 0x64b   : > { %v2265_v20 = vpop.f32.mrf.mxu2  ;;  %v2278_v29 = vpop.f32.mrf.mxu3 }
 0x64c   : > { %v2266_v49 = vadd.f32 %v2265_v20, %v2230_v27  ;;  %v2279_v50 = vadd.f32 %v2278_v29, %v2243_v25 }
 0x64d   : > { %v2312_v30 = vpop.f32.mrf.mxu0  ;;  %v2325_v35 = vpop.f32.mrf.mxu1 }
 0x64e   : > { %v2329_v57 = vadd.f32 %v2312_v30, %v2266_v49  ;;  %v2330_v58 = vadd.f32 %v2325_v35, %v2279_v50 }
 0x653   : > { %v2267_v21 = vpop.f32.mrf.mxu2  ;;  %v2280_v36 = vpop.f32.mrf.mxu3 }
 0x655   : > { %v2314_v37 = vpop.f32.mrf.mxu0  ;;  %v2327_v38 = vpop.f32.mrf.mxu1 }
 0x65b   : > { %v2361_v39 = vpop.f32.mrf.mxu2  ;;  %v2374_v40 = vpop.f32.mrf.mxu3 }
 0x65c   : > { %v2378_v61 = vadd.f32 %v2361_v39, %v2329_v57  ;;  %v2379_v1 = vadd.f32 %v2374_v40, %v2330_v58 }
 0x65d   : > { %v2400_v48 = vpop.f32.mrf.mxu0  ;;  %v2413_v32 = vpop.f32.mrf.mxu1 }
 0x65e   : > { %v2417_v59 = vadd.f32 %v2400_v48, %v2378_v61  ;;  %v2418_v60 = vadd.f32 %v2413_v32, %v2379_v1 }
 0x663   : > { %v2363_v33 = vpop.f32.mrf.mxu2  ;;  %v2376_v43 = vpop.f32.mrf.mxu3 }
 0x665   : > { %v2402_v41 = vpop.f32.mrf.mxu0  ;;  %v2415_v42 = vpop.f32.mrf.mxu1 }
 0x66b   : > { %v2449_v51 = vpop.f32.mrf.mxu2  ;;  %v2462_v52 = vpop.f32.mrf.mxu3 }
 0x66c   : > { %v2466_v14 = vadd.f32 %v2449_v51, %v2417_v59  ;;  %v2467_v6 = vadd.f32 %v2462_v52, %v2418_v60 }
 0x66d   : > { %v2498_v24 = vpop.f32.mrf.mxu0  ;;  %v2511_v56 = vpop.f32.mrf.mxu1 }
 0x66e   : > { %v2515_v2 = vadd.f32 %v2498_v24, %v2466_v14  ;;  %v2516_v3 = vadd.f32 %v2511_v56, %v2467_v6 }
 0x673   : > { %v2451_v0 = vpop.f32.mrf.mxu2  ;;  %v2464_v46 = vpop.f32.mrf.mxu3 }
 0x675   : > { %v2500_v13 = vpop.f32.mrf.mxu0  ;;  %v2513_v47 = vpop.f32.mrf.mxu1 }
 0x67b   : > { %v2547_v44 = vpop.f32.mrf.mxu2  ;;  %v2560_v45 = vpop.f32.mrf.mxu3 }
 0x67c   : > { %v2564_v4 = vadd.f32 %v2547_v44, %v2515_v2  ;;  %v2565_v5 = vadd.f32 %v2560_v45, %v2516_v3 }
 0x67d   : > { %v2596_v54 = vpop.f32.mrf.mxu0  ;;  %v2609_v31 = vpop.f32.mrf.mxu1 }
 0x67e   : > { %v2613_v34 = vadd.f32 %v2596_v54, %v2564_v4  ;;  %v2614_v7 = vadd.f32 %v2609_v31, %v2565_v5 }
 0x680   : > { %v2619_v8 = vadd.f32 %v2617_v55, %v2613_v34  ;;  %v2620_v9 = vadd.f32 %v2617_v55, %v2614_v7 }
 0x682   : > { %v2621_v10 = vadd.f32 %v2619_v8, %v3461_v12  ;;  %v2622_v11 = vadd.f32 %v2620_v9, %v3463_v15 }
 0x683   : > { %v2549_v62 = vpop.f32.mrf.mxu2  ;;  %v2562_v16 = vpop.f32.mrf.mxu3 }
 0x684   : > { %2623 = vst [vmem:[%s352_s17] sm:$0xff] %v2621_v10 }
 0x685   : > { %2624 = vst [vmem:[%s352_s17 + $0x8] sm:$0xff] %v2622_v11  ;;  %v2598_v63 = vpop.f32.mrf.mxu0  ;;  %v2611_v17 = vpop.f32.mrf.mxu1 }
 0x686 PF: > { %s19_s30 = sadd.s32 1, %s2875_s30  }
 0x687   : > { %p16_p4 = scmp.ge.s32.totalorder %s19_s30, 4  }
 0x689   :  { %18 = sbr.rel (!%p16_p4) target bundleno = 1 (0x1), region = 129 }

</bundles_post_ra>
